<compile_context>
chip_gen: v7x
topology: tpu7x:2x2x1
jax: 0.10.0
libtpu: 0.0.40
codegen_flags: <defaults>
</compile_context>

<pallas_src>
import jax
import jax.numpy as jnp
from jax.experimental import pallas as pl
from jax.experimental.pallas import tpu as pltpu


def _pooler_kernel(x_ref, w_ref, b_ref, out_ref):
    # x_ref: [tb, H_in] CLS rows; w_ref: [H_in, tn] (K-major, pre-transposed);
    # b_ref: [1, tn] f32; out_ref: [tb, tn].
    y = jnp.dot(x_ref[...], w_ref[...], preferred_element_type=jnp.float32)
    out_ref[...] = jnp.tanh(y + b_ref[...]).astype(out_ref.dtype)


def vit_pooler(hidden_states, weight, bias, *, cast_to_bf16=False):
    """hidden_states: [B, S, H]; weight: [H, H] (nn.Linear [out, in]); bias: [H] -> [B, H]."""
    B, S, H = hidden_states.shape
    out_dtype = hidden_states.dtype

    if H % 128 == 0:
        # Lane-dense path: view as [B, S*H]; a (tb, H) block at column-block 0 is a
        # strided DMA of exactly the CLS tokens (token 0 occupies the first H cols).
        x2d = hidden_states.reshape(B, S * H)
    else:
        # Small / odd-H escape hatch: full-array blocks; slice CLS in the wrapper.
        x2d = hidden_states[:, 0, :]

    w_t = jnp.transpose(weight)                       # [H_in, H_out], one-time, K-major for MXU
    bias2d = bias.reshape(1, H).astype(jnp.float32)   # bias / tanh stay f32

    if cast_to_bf16:
        # MXU fast path: bf16 operands, f32 accumulate. Halves weight HBM/VMEM bytes
        # and avoids f32 multi-pass MXU emulation (biggest relative win on v5e).
        x2d = x2d.astype(jnp.bfloat16)
        w_t = w_t.astype(jnp.bfloat16)

    # Batch tile: one block if B <= 256, else 256-row tiles (ragged tail is masked).
    tb = B if B <= 256 else 256
    # Output-feature tile: full H when small / non-128-multiple, else 256 (lane-dense,
    # matches v7x 2x256 MXU; lets megacore shard N so the weight is only read once).
    tn = H if (H <= 256 or H % 128 != 0) else 256
    grid = (pl.cdiv(B, tb), pl.cdiv(H, tn))

    in_b = jnp.dtype(x2d.dtype).itemsize
    w_b = jnp.dtype(w_t.dtype).itemsize
    out_b = jnp.dtype(out_dtype).itemsize
    # Double-buffered tiles (Pallas default) + margin; explicit limit so large-H f32
    # variants still fit v5e's 16 MiB default scoped VMEM without shrinking tiles.
    vmem_need = 2 * (tb * H * in_b + H * tn * w_b + tn * 4 + tb * tn * out_b)
    vmem_limit = int(min(max(vmem_need + (4 << 20), 16 << 20), 48 << 20))

    # TODO(synk): for H >= ~8192 with f32 weights, add K (H_in) tiling with a VMEM
    # f32 accumulator (pl.when init/finalize) instead of a full-K weight block.
    return pl.pallas_call(
        _pooler_kernel,
        out_shape=jax.ShapeDtypeStruct((B, H), out_dtype),
        grid_spec=pltpu.PrefetchScalarGridSpec(
            num_scalar_prefetch=0,
            grid=grid,
            in_specs=[
                pl.BlockSpec((tb, H), lambda i, j: (i, 0)),   # CLS rows (strided DMA gather)
                pl.BlockSpec((H, tn), lambda i, j: (0, j)),   # weight tile, streams over N
                pl.BlockSpec((1, tn), lambda i, j: (0, j)),   # bias tile
            ],
            out_specs=pl.BlockSpec((tb, tn), lambda i, j: (i, j)),
        ),
        compiler_params=pltpu.CompilerParams(
            dimension_semantics=("parallel", "parallel"),
            vmem_limit_bytes=vmem_limit,
        ),
    )(x2d, w_t, bias2d)


def vit_pooler_ref(hidden_states, weight, bias):
    cls_tok = hidden_states[:, 0, :]
    return jnp.tanh(cls_tok @ weight.T + bias)


if __name__ == "__main__":
    key = jax.random.PRNGKey(0)
    k_hs, k_w, k_b = jax.random.split(key, 3)

    # ViT-Small-like pooler at small batch: non-power-of-two B, H multiple of 128
    # (exercises the lane-dense in-DMA CLS gather and a ragged N tile: 384 = 256 + 128).
    B, S, H = 3, 8, 384
    hidden_states = jax.random.normal(k_hs, (B, S, H), dtype=jnp.float32)
    weight = jax.random.normal(k_w, (H, H), dtype=jnp.float32) * 0.05
    bias = jax.random.normal(k_b, (H,), dtype=jnp.float32) * 0.01

    pooler = jax.jit(vit_pooler, static_argnames=("cast_to_bf16",))

    out = jax.block_until_ready(pooler(hidden_states, weight, bias))
    ref = vit_pooler_ref(hidden_states, weight, bias)
    assert out.shape == (B, H)
    assert jnp.allclose(out, ref, atol=5e-5, rtol=5e-5)

    # bf16 operand fast path (f32 accumulate): looser tolerance vs. the f32 reference.
    out_bf16 = jax.block_until_ready(pooler(hidden_states, weight, bias, cast_to_bf16=True))
    assert jnp.allclose(out_bf16, ref, atol=3e-2, rtol=3e-2)

    # Small / odd-H escape hatch (full-array blocks, CLS sliced in the wrapper).
    B2, S2, H2 = 2, 4, 32
    hs2 = jax.random.normal(k_hs, (B2, S2, H2), dtype=jnp.float32)
    w2 = jax.random.normal(k_w, (H2, H2), dtype=jnp.float32) * 0.05
    b2 = jax.random.normal(k_b, (H2,), dtype=jnp.float32) * 0.01
    out2 = jax.block_until_ready(pooler(hs2, w2, b2))
    assert jnp.allclose(out2, vit_pooler_ref(hs2, w2, b2), atol=1e-5, rtol=1e-5)

    print("KERNEL_OK")
</pallas_src>

<mosaic_0001>
module attributes {stable_mosaic.version = 11 : i64} {
  func.func @_pooler_kernel(%arg0: i32, %arg1: i32, %arg2: memref<3x384xf32, #tpu.memory_space<vmem>>, %arg3: memref<384x256xf32, #tpu.memory_space<vmem>>, %arg4: memref<1x256xf32, #tpu.memory_space<vmem>>, %arg5: memref<3x256xf32, #tpu.memory_space<vmem>>) attributes {dimension_semantics = [#tpu.dimension_semantics<parallel>, #tpu.dimension_semantics<parallel>], iteration_bounds = array<i64: 1, 2>, scalar_prefetch = 0 : i64, scratch_operands = 0 : i64, tpu.core_type = #tpu.core_type<tc>, window_params = [{transform_indices = @transform_0, window_bounds = array<i64: 3, 384>}, {transform_indices = @transform_1, window_bounds = array<i64: 384, 256>}, {transform_indices = @transform_2, window_bounds = array<i64: 1, 256>}, {transform_indices = @transform_3, window_bounds = array<i64: 3, 256>}]} {
    %c0 = arith.constant 0 : index
    %c0_0 = arith.constant 0 : index
    %0 = vector.load %arg2[%c0, %c0_0] : memref<3x384xf32, #tpu.memory_space<vmem>>, vector<3x384xf32>
    %c0_1 = arith.constant 0 : index
    %c0_2 = arith.constant 0 : index
    %1 = vector.load %arg3[%c0_1, %c0_2] : memref<384x256xf32, #tpu.memory_space<vmem>>, vector<384x256xf32>
    %cst = arith.constant dense<0.000000e+00> : vector<3x256xf32>
    %2 = tpu.matmul %0, %1, %cst {dimension_numbers = #tpu.dot_dimension_numbers<[1], [0], [0], [1], [0, 0, 1, 1], [], []>} : vector<3x384xf32>, vector<384x256xf32>, vector<3x256xf32> -> vector<3x256xf32>
    %c0_3 = arith.constant 0 : index
    %c0_4 = arith.constant 0 : index
    %3 = vector.load %arg4[%c0_3, %c0_4] : memref<1x256xf32, #tpu.memory_space<vmem>>, vector<1x256xf32>
    %4 = vector.broadcast %3 : vector<1x256xf32> to vector<3x256xf32>
    %5 = arith.addf %2, %4 : vector<3x256xf32>
    %6 = math.tanh %5 : vector<3x256xf32>
    %c0_5 = arith.constant 0 : index
    %c0_6 = arith.constant 0 : index
    %7 = vector.load %arg5[%c0_5, %c0_6] : memref<3x256xf32, #tpu.memory_space<vmem>>, vector<3x256xf32>
    tpu.vector_store %arg5[%c0_5, %c0_6], %6 {strides = array<i32>} : memref<3x256xf32, #tpu.memory_space<vmem>>, vector<3x256xf32>,
    return
  }
  func.func @transform_0(%arg0: i32, %arg1: i32) -> (i32, i32) {
    %c0_i32 = arith.constant 0 : i32
    %c0_i32_0 = arith.constant 0 : i32
    return %arg0, %c0_i32 : i32, i32
  }
  func.func @transform_1(%arg0: i32, %arg1: i32) -> (i32, i32) {
    %c0_i32 = arith.constant 0 : i32
    %c0_i32_0 = arith.constant 0 : i32
    return %c0_i32, %arg1 : i32, i32
  }
  func.func @transform_2(%arg0: i32, %arg1: i32) -> (i32, i32) {
    %c0_i32 = arith.constant 0 : i32
    %c0_i32_0 = arith.constant 0 : i32
    return %c0_i32, %arg1 : i32, i32
  }
  func.func @transform_3(%arg0: i32, %arg1: i32) -> (i32, i32) {
    %c0_i32 = arith.constant 0 : i32
    return %arg0, %arg1 : i32, i32
  }
}

</mosaic_0001>

<bundles_post_ra>
// kernel: vit_pooler.1
= control target key start
LH: loop header
LB: loop body
LE: loop exit
PB: predicated region body
PF: predicated region fallthrough
CT: control target
= control target key end

     0   :  { %s3649_s0 = inlined_call_operand.vmem [shape: f32[3,3072], index: 0, kind: input, shape index: {}]   ;;  %s3650_s1 = inlined_call_operand.vmem [shape: f32[384,384], index: 1, kind: input, shape index: {}]   ;;  %s3651_s2 = inlined_call_operand.vmem [shape: f32[1,384], index: 2, kind: input, shape index: {}]   ;;  %s3652_s3 = inlined_call_operand.hbm [shape: f32[3,384], index: 3, kind: output, shape index: {}]  }
   0x1   :  { %3654 = sst [smem:[#allocation7_spill]] %s3650_s1 }
   0x2   :  { %8 = vsyncpa [#allocation4], 0 }
   0x3   :  { %10 = vsyncpa [#allocation4 + $0x1], 0  ;;  %s2204_s12 = smov 0   ;;  %s2206_s13 = smov 0  }
   0x4   :  { %s2208_s14 = smov 0   ;;  %s2210_s15 = smov 0  }
   0x5   :  { %s2212_s16 = smov 0   ;;  %s2214_s17 = smov 0  }
   0x6 LB: > { %s1632_s18 = sadd.s32 4294967295, %s2114_s17   ;;  %s1633_s19 = sadd.s32 4294967294, %s2114_s17   ;;  %s2114_s17 = sphi %s2214_s17, %s16_s17   ;;  %s2110_s16 = sphi %s2212_s16, %s3684_s16   ;;  %s2106_s15 = sphi %s2210_s15, %s3683_s15   ;;  %s2102_s14 = sphi %s2208_s14, %s3682_s14   ;;  %s2098_s13 = sphi %s2206_s13, %s3681_s13   ;;  %s2094_s12 = sphi %s2204_s12, %s3680_s12  }
   0x7   : > { %s25_s20 = sadd.s32 1, %s2110_s16  ;;  %s61_s21 = sadd.s32 1, %s2102_s14 }
   0x8   : > { %p26_p0 = scmp.ge.s32.totalorder %s25_s20, 2  ;;  %p68_p1 = scmp.ne.s32.totalorder %s2102_s14, %s2098_s13 }
   0x9   : > { %p69_p2 = scmp.eq.s32.totalorder %s2114_s17, 0  ;;  %p126_p3 = scmp.eq.s32.totalorder %s1632_s18, 1 }
   0xa   : > { %s3686_s20 = smov (%p26_p0, %s25_s20), 0  ;;  %p131_p6 = scmp.ne.s32.totalorder %s2098_s13, %s2094_s12 }
   0xb   : > { %3655 = sst [smem:[#allocation6_spill]] %s3686_s20  ;;  %p70_p4 = por %p69_p2, %p68_p1 }
   0xc   : > { %p2243_p5 = por %p126_p3, %p68_p1  ;;  %s58_s23 = ssub.s32 %s2110_s16, %s3686_s20 }
   0xd   : > { %p59_p7 = scmp.eq.s32.totalorder %s58_s23, 0  ;;  %p132_p8 = scmp.eq.s32.totalorder %s1633_s19, 1 }
   0xe   : > { %p1636_p10 = scmp.ge.s32.totalorder %s2114_s17, 2 }
   0xf   : > { %s2252_s24 = scalar_select %p59_p7, %s2102_s14, %s61_s21  }
  0x10   : > { %p2254_p9 = por %p132_p8, %p131_p6  ;;  %156 = sbr.rel (%p1636_p10) target bundleno = 346 (0x15a), region = 20 }
  0x17   : > { %159 = sbr.rel (!%p70_p4) target bundleno = 346 (0x15a), region = 24  ;;  %s161_s26 = sand.u32 (%p70_p4), 1, %s2102_s14  }
  0x18   : > { %s1637_s27 = sshll.u32 (%p70_p4), %s2110_s16, 1  ;;  %s1780_s28 = smul.u32 (%p70_p4), 768, %s161_s26 }
  0x19   : > { %s165_s29 = ssub.s32 (%p70_p4), 3, %s1637_s27  ;;  %s1674_s30 = sshll.u32 (%p70_p4), %s2110_s16, 4 }
  0x1a   : > { %p166_p11 = scmp.lt.s32.totalorder (%p70_p4), %s165_s29, 2  ;;  %s3658_s1 = sld [smem:[#allocation7_spill]] (%p70_p4) }
  0x1b   : > { %s2271_s9 = scalar_lea.vmem (%p70_p4), [#allocation2], %s1780_s28  }
  0x1e   : > { %s3688_s29 = smov (!%p166_p11, %s165_s29), 2 }
  0x1f   : > { %s168_s7 = smul.u32 6144, %s3688_s29  ;;  %s2269_s8 = sshll.u32 %s3688_s29, 3 }
  0x20   : > { %s2267_s6 = scalar_lea.vmem %s3658_s1, %s1674_s30  }
  0x21   : > { %p1641_p12 = scmp.eq.s32.totalorder %s168_s7, 0 }
  0x22   : > { %p176_p13 = scmp.lt.u32.totalorder (!%p1641_p12), %s2269_s8, 8 }
  0x23   : > { %175 = sbr.rel (%p1641_p12) target bundleno = 346 (0x15a), region = 28 }
  0x2a   : > { %179 = sbr.rel (%p176_p13) target bundleno = 295 (0x127), region = 32  ;;  %s2275_s10 = sand.u32 (!%p176_p13), 7, %s2269_s8  }
  0x2b   : > { %p289_p0 = scmp.eq.s32.totalorder (!%p176_p13), %s2275_s10, 0  ;;  %p1642_p1 = scmp.ne.s32.totalorder (!%p176_p13), %s2275_s10, 0 }
  0x31   : > { %292 = sbr.rel (%p1642_p1) target bundleno = 147 (0x93), region = 47  ;;  %s293_s11 = sshrl.u32 (!%p1642_p1), %s2269_s8, 3 }
  0x32   : > { %s2282_s18 = sshrl.u32 (!%p1642_p1), %s293_s11, 1 }
  0x33   : > { %p1643_p2 = scmp.le.s32.totalorder (!%p1642_p1), %s2282_s18, 0 }
  0x38   : > { %1537 = sbr.rel (%p1643_p2) target bundleno = 112 (0x70), region = 156  ;;  %s3659_s19 = smov (!%p1643_p2), %s2271_s9 }
  0x39   : > { %s3660_s21 = smov (!%p1643_p2), %s2267_s6  ;;  %s2291_s23 = smov (!%p1643_p2), 0  }
  0x3a   : > { %s2293_s26 = smov (!%p1643_p2), 0  }
  0x3f LB: >> { %v306_v0 = vld [vmem:[%s2122_s21] sm:$0xff]  ;;  %v308_v1 = vld [vmem:[%s2122_s21 + $0x8] sm:$0xff]  ;;  %v310_v2 = vld [vmem:[%s2122_s21 + $0x18] sm:$0xff]  ;;  %s498_s27 = sadd.s32 1, %s2126_s23  ;;  %s300_s26 = sadd.s32 1, %s2130_s26   ;;  %s2130_s26 = sphi %s2293_s26, %s300_s26   ;;  %s2126_s23 = sphi %s2291_s23, %s3663_s23   ;;  %s2122_s21 = sphi %s3660_s21, %s3662_s21   ;;  %s2118_s19 = sphi %s3659_s19, %s3661_s19  }
  0x40   : >> { %307 = vst [vmem:[%s2118_s19] sm:$0xff] %v306_v0  ;;  %309 = vst [vmem:[%s2118_s19 + $0x8] sm:$0xff] %v308_v1  ;;  %v312_v3 = vld [vmem:[%s2122_s21 + $0x20] sm:$0xff]  ;;  %v314_v4 = vld [vmem:[%s2122_s21 + $0x30] sm:$0xff]  ;;  %p499_p3 = scmp.ge.s32.totalorder %s498_s27, %s2282_s18  ;;  %p299_p4 = scmp.ge.s32.totalorder %s300_s26, %s2282_s18 }
  0x41   : >> { %311 = vst [vmem:[%s2118_s19 + $0x10] sm:$0xff] %v310_v2  ;;  %v316_v5 = vld [vmem:[%s2122_s21 + $0x38] sm:$0xff]  ;;  %313 = vst [vmem:[%s2118_s19 + $0x18] sm:$0xff] %v312_v3  ;;  %v318_v6 = vld [vmem:[%s2122_s21 + $0x48] sm:$0xff] }
  0x42   : >> { %315 = vst [vmem:[%s2118_s19 + $0x20] sm:$0xff] %v314_v4  ;;  %317 = vst [vmem:[%s2118_s19 + $0x28] sm:$0xff] %v316_v5  ;;  %v320_v7 = vld [vmem:[%s2122_s21 + $0x50] sm:$0xff]  ;;  %v322_v8 = vld [vmem:[%s2122_s21 + $0x60] sm:$0xff]  ;;  %s3690_s27 = smov (%p499_p3, %s498_s27), 0 }
  0x43   : >> { %319 = vst [vmem:[%s2118_s19 + $0x30] sm:$0xff] %v318_v6  ;;  %321 = vst [vmem:[%s2118_s19 + $0x38] sm:$0xff] %v320_v7  ;;  %v324_v9 = vld [vmem:[%s2122_s21 + $0x68] sm:$0xff]  ;;  %v326_v10 = vld [vmem:[%s2122_s21 + $0x78] sm:$0xff]  ;;  %s1644_s28 = sshll.u32 %s3690_s27, 4  ;;  %s3663_s23 = smov %s3690_s27 }
  0x44   : >> { %323 = vst [vmem:[%s2118_s19 + $0x40] sm:$0xff] %v322_v8  ;;  %v328_v11 = vld [vmem:[%s2122_s21 + $0x80] sm:$0xff]  ;;  %325 = vst [vmem:[%s2118_s19 + $0x48] sm:$0xff] %v324_v9  ;;  %v330_v12 = vld [vmem:[%s2122_s21 + $0x90] sm:$0xff]  ;;  %s2349_s29 = scalar_lea.vmem %s2267_s6, %s1644_s28   ;;  %s2352_s30 = scalar_lea.vmem %s2271_s9, %s1644_s28 [#allocation2]  }
  0x45   : >> { %327 = vst [vmem:[%s2118_s19 + $0x50] sm:$0xff] %v326_v10  ;;  %329 = vst [vmem:[%s2118_s19 + $0x58] sm:$0xff] %v328_v11  ;;  %v332_v13 = vld [vmem:[%s2122_s21 + $0x98] sm:$0xff]  ;;  %v334_v14 = vld [vmem:[%s2122_s21 + $0xa8] sm:$0xff] }
  0x46   : >> { %331 = vst [vmem:[%s2118_s19 + $0x60] sm:$0xff] %v330_v12  ;;  %333 = vst [vmem:[%s2118_s19 + $0x68] sm:$0xff] %v332_v13  ;;  %v336_v15 = vld [vmem:[%s2122_s21 + $0xb0] sm:$0xff]  ;;  %v338_v16 = vld [vmem:[%s2122_s21 + $0xc0] sm:$0xff] }
  0x47   : >> { %335 = vst [vmem:[%s2118_s19 + $0x70] sm:$0xff] %v334_v14  ;;  %v340_v17 = vld [vmem:[%s2122_s21 + $0xc8] sm:$0xff]  ;;  %337 = vst [vmem:[%s2118_s19 + $0x78] sm:$0xff] %v336_v15  ;;  %v342_v18 = vld [vmem:[%s2122_s21 + $0xd8] sm:$0xff] }
  0x48   : >> { %339 = vst [vmem:[%s2118_s19 + $0x80] sm:$0xff] %v338_v16  ;;  %341 = vst [vmem:[%s2118_s19 + $0x88] sm:$0xff] %v340_v17  ;;  %v344_v19 = vld [vmem:[%s2122_s21 + $0xe0] sm:$0xff]  ;;  %v346_v20 = vld [vmem:[%s2122_s21 + $0xf0] sm:$0xff] }
  0x49   : >> { %343 = vst [vmem:[%s2118_s19 + $0x90] sm:$0xff] %v342_v18  ;;  %345 = vst [vmem:[%s2118_s19 + $0x98] sm:$0xff] %v344_v19  ;;  %v348_v21 = vld [vmem:[%s2122_s21 + $0xf8] sm:$0xff]  ;;  %v350_v22 = vld [vmem:[%s2122_s21 + $0x108] sm:$0xff] }
  0x4a   : >> { %347 = vst [vmem:[%s2118_s19 + $0xa0] sm:$0xff] %v346_v20  ;;  %v352_v23 = vld [vmem:[%s2122_s21 + $0x110] sm:$0xff]  ;;  %349 = vst [vmem:[%s2118_s19 + $0xa8] sm:$0xff] %v348_v21  ;;  %v354_v24 = vld [vmem:[%s2122_s21 + $0x120] sm:$0xff] }
  0x4b   : >> { %351 = vst [vmem:[%s2118_s19 + $0xb0] sm:$0xff] %v350_v22  ;;  %353 = vst [vmem:[%s2118_s19 + $0xb8] sm:$0xff] %v352_v23  ;;  %v356_v25 = vld [vmem:[%s2122_s21 + $0x128] sm:$0xff]  ;;  %v358_v26 = vld [vmem:[%s2122_s21 + $0x138] sm:$0xff] }
  0x4c   : >> { %355 = vst [vmem:[%s2118_s19 + $0xc0] sm:$0xff] %v354_v24  ;;  %357 = vst [vmem:[%s2118_s19 + $0xc8] sm:$0xff] %v356_v25  ;;  %v360_v27 = vld [vmem:[%s2122_s21 + $0x140] sm:$0xff]  ;;  %v362_v28 = vld [vmem:[%s2122_s21 + $0x150] sm:$0xff] }
  0x4d   : >> { %359 = vst [vmem:[%s2118_s19 + $0xd0] sm:$0xff] %v358_v26  ;;  %v364_v29 = vld [vmem:[%s2122_s21 + $0x158] sm:$0xff]  ;;  %361 = vst [vmem:[%s2118_s19 + $0xd8] sm:$0xff] %v360_v27  ;;  %v366_v30 = vld [vmem:[%s2122_s21 + $0x168] sm:$0xff] }
  0x4e   : >> { %363 = vst [vmem:[%s2118_s19 + $0xe0] sm:$0xff] %v362_v28  ;;  %365 = vst [vmem:[%s2118_s19 + $0xe8] sm:$0xff] %v364_v29  ;;  %v368_v31 = vld [vmem:[%s2122_s21 + $0x170] sm:$0xff]  ;;  %v370_v32 = vld [vmem:[%s2122_s21 + $0x180] sm:$0xff] }
  0x4f   : >> { %367 = vst [vmem:[%s2118_s19 + $0xf0] sm:$0xff] %v366_v30  ;;  %369 = vst [vmem:[%s2118_s19 + $0xf8] sm:$0xff] %v368_v31  ;;  %v372_v33 = vld [vmem:[%s2122_s21 + $0x188] sm:$0xff]  ;;  %v374_v34 = vld [vmem:[%s2122_s21 + $0x198] sm:$0xff] }
  0x50   : >> { %371 = vst [vmem:[%s2118_s19 + $0x100] sm:$0xff] %v370_v32  ;;  %v376_v35 = vld [vmem:[%s2122_s21 + $0x1a0] sm:$0xff]  ;;  %373 = vst [vmem:[%s2118_s19 + $0x108] sm:$0xff] %v372_v33  ;;  %v378_v36 = vld [vmem:[%s2122_s21 + $0x1b0] sm:$0xff] }
  0x51   : >> { %375 = vst [vmem:[%s2118_s19 + $0x110] sm:$0xff] %v374_v34  ;;  %377 = vst [vmem:[%s2118_s19 + $0x118] sm:$0xff] %v376_v35  ;;  %v380_v37 = vld [vmem:[%s2122_s21 + $0x1b8] sm:$0xff]  ;;  %v382_v38 = vld [vmem:[%s2122_s21 + $0x1c8] sm:$0xff] }
  0x52   : >> { %379 = vst [vmem:[%s2118_s19 + $0x120] sm:$0xff] %v378_v36  ;;  %381 = vst [vmem:[%s2118_s19 + $0x128] sm:$0xff] %v380_v37  ;;  %v384_v39 = vld [vmem:[%s2122_s21 + $0x1d0] sm:$0xff]  ;;  %v386_v40 = vld [vmem:[%s2122_s21 + $0x1e0] sm:$0xff] }
  0x53   : >> { %383 = vst [vmem:[%s2118_s19 + $0x130] sm:$0xff] %v382_v38  ;;  %v388_v41 = vld [vmem:[%s2122_s21 + $0x1e8] sm:$0xff]  ;;  %385 = vst [vmem:[%s2118_s19 + $0x138] sm:$0xff] %v384_v39  ;;  %v390_v42 = vld [vmem:[%s2122_s21 + $0x1f8] sm:$0xff] }
  0x54   : >> { %387 = vst [vmem:[%s2118_s19 + $0x140] sm:$0xff] %v386_v40  ;;  %389 = vst [vmem:[%s2118_s19 + $0x148] sm:$0xff] %v388_v41  ;;  %v392_v43 = vld [vmem:[%s2122_s21 + $0x200] sm:$0xff]  ;;  %v394_v44 = vld [vmem:[%s2122_s21 + $0x210] sm:$0xff] }
  0x55   : >> { %391 = vst [vmem:[%s2118_s19 + $0x150] sm:$0xff] %v390_v42  ;;  %393 = vst [vmem:[%s2118_s19 + $0x158] sm:$0xff] %v392_v43  ;;  %v396_v45 = vld [vmem:[%s2122_s21 + $0x218] sm:$0xff]  ;;  %v398_v46 = vld [vmem:[%s2122_s21 + $0x228] sm:$0xff] }
  0x56   : >> { %395 = vst [vmem:[%s2118_s19 + $0x160] sm:$0xff] %v394_v44  ;;  %v400_v47 = vld [vmem:[%s2122_s21 + $0x230] sm:$0xff]  ;;  %397 = vst [vmem:[%s2118_s19 + $0x168] sm:$0xff] %v396_v45  ;;  %v402_v48 = vld [vmem:[%s2122_s21 + $0x240] sm:$0xff] }
  0x57   : >> { %399 = vst [vmem:[%s2118_s19 + $0x170] sm:$0xff] %v398_v46  ;;  %401 = vst [vmem:[%s2118_s19 + $0x178] sm:$0xff] %v400_v47  ;;  %v404_v49 = vld [vmem:[%s2122_s21 + $0x248] sm:$0xff]  ;;  %v406_v50 = vld [vmem:[%s2122_s21 + $0x258] sm:$0xff] }
  0x58   : >> { %403 = vst [vmem:[%s2118_s19 + $0x180] sm:$0xff] %v402_v48  ;;  %405 = vst [vmem:[%s2118_s19 + $0x188] sm:$0xff] %v404_v49  ;;  %v408_v51 = vld [vmem:[%s2122_s21 + $0x260] sm:$0xff]  ;;  %v410_v52 = vld [vmem:[%s2122_s21 + $0x270] sm:$0xff] }
  0x59   : >> { %407 = vst [vmem:[%s2118_s19 + $0x190] sm:$0xff] %v406_v50  ;;  %v412_v53 = vld [vmem:[%s2122_s21 + $0x278] sm:$0xff]  ;;  %409 = vst [vmem:[%s2118_s19 + $0x198] sm:$0xff] %v408_v51  ;;  %v414_v54 = vld [vmem:[%s2122_s21 + $0x288] sm:$0xff] }
  0x5a   : >> { %411 = vst [vmem:[%s2118_s19 + $0x1a0] sm:$0xff] %v410_v52  ;;  %413 = vst [vmem:[%s2118_s19 + $0x1a8] sm:$0xff] %v412_v53  ;;  %v416_v55 = vld [vmem:[%s2122_s21 + $0x290] sm:$0xff]  ;;  %v418_v56 = vld [vmem:[%s2122_s21 + $0x2a0] sm:$0xff] }
  0x5b   : >> { %415 = vst [vmem:[%s2118_s19 + $0x1b0] sm:$0xff] %v414_v54  ;;  %417 = vst [vmem:[%s2118_s19 + $0x1b8] sm:$0xff] %v416_v55  ;;  %v420_v57 = vld [vmem:[%s2122_s21 + $0x2a8] sm:$0xff]  ;;  %v422_v58 = vld [vmem:[%s2122_s21 + $0x2b8] sm:$0xff] }
  0x5c   : >> { %419 = vst [vmem:[%s2118_s19 + $0x1c0] sm:$0xff] %v418_v56  ;;  %v424_v59 = vld [vmem:[%s2122_s21 + $0x2c0] sm:$0xff]  ;;  %421 = vst [vmem:[%s2118_s19 + $0x1c8] sm:$0xff] %v420_v57  ;;  %v426_v60 = vld [vmem:[%s2122_s21 + $0x2d0] sm:$0xff] }
  0x5d   : >> { %423 = vst [vmem:[%s2118_s19 + $0x1d0] sm:$0xff] %v422_v58  ;;  %425 = vst [vmem:[%s2118_s19 + $0x1d8] sm:$0xff] %v424_v59  ;;  %v428_v61 = vld [vmem:[%s2122_s21 + $0x2d8] sm:$0xff]  ;;  %v430_v62 = vld [vmem:[%s2122_s21 + $0x2e8] sm:$0xff] }
  0x5e   : >> { %427 = vst [vmem:[%s2118_s19 + $0x1e0] sm:$0xff] %v426_v60  ;;  %429 = vst [vmem:[%s2118_s19 + $0x1e8] sm:$0xff] %v428_v61  ;;  %v432_v63 = vld [vmem:[%s2122_s21 + $0x2f0] sm:$0xff]  ;;  %v434_v0 = vld [vmem:[%s2122_s21 + $0x300] sm:$0xff] }
  0x5f   : >> { %431 = vst [vmem:[%s2118_s19 + $0x1f0] sm:$0xff] %v430_v62  ;;  %v436_v1 = vld [vmem:[%s2122_s21 + $0x308] sm:$0xff]  ;;  %433 = vst [vmem:[%s2118_s19 + $0x1f8] sm:$0xff] %v432_v63  ;;  %v438_v2 = vld [vmem:[%s2122_s21 + $0x318] sm:$0xff] }
  0x60   : >> { %435 = vst [vmem:[%s2118_s19 + $0x200] sm:$0xff] %v434_v0  ;;  %437 = vst [vmem:[%s2118_s19 + $0x208] sm:$0xff] %v436_v1  ;;  %v440_v3 = vld [vmem:[%s2122_s21 + $0x320] sm:$0xff]  ;;  %v442_v4 = vld [vmem:[%s2122_s21 + $0x330] sm:$0xff] }
  0x61   : >> { %439 = vst [vmem:[%s2118_s19 + $0x210] sm:$0xff] %v438_v2  ;;  %441 = vst [vmem:[%s2118_s19 + $0x218] sm:$0xff] %v440_v3  ;;  %v444_v5 = vld [vmem:[%s2122_s21 + $0x338] sm:$0xff]  ;;  %v446_v6 = vld [vmem:[%s2122_s21 + $0x348] sm:$0xff] }
  0x62   : >> { %443 = vst [vmem:[%s2118_s19 + $0x220] sm:$0xff] %v442_v4  ;;  %v448_v7 = vld [vmem:[%s2122_s21 + $0x350] sm:$0xff]  ;;  %445 = vst [vmem:[%s2118_s19 + $0x228] sm:$0xff] %v444_v5  ;;  %v450_v8 = vld [vmem:[%s2122_s21 + $0x360] sm:$0xff] }
  0x63   : >> { %447 = vst [vmem:[%s2118_s19 + $0x230] sm:$0xff] %v446_v6  ;;  %449 = vst [vmem:[%s2118_s19 + $0x238] sm:$0xff] %v448_v7  ;;  %v452_v9 = vld [vmem:[%s2122_s21 + $0x368] sm:$0xff]  ;;  %v454_v10 = vld [vmem:[%s2122_s21 + $0x378] sm:$0xff] }
  0x64   : >> { %451 = vst [vmem:[%s2118_s19 + $0x240] sm:$0xff] %v450_v8  ;;  %453 = vst [vmem:[%s2118_s19 + $0x248] sm:$0xff] %v452_v9  ;;  %v456_v11 = vld [vmem:[%s2122_s21 + $0x380] sm:$0xff]  ;;  %v458_v12 = vld [vmem:[%s2122_s21 + $0x390] sm:$0xff] }
  0x65   : >> { %455 = vst [vmem:[%s2118_s19 + $0x250] sm:$0xff] %v454_v10  ;;  %v460_v13 = vld [vmem:[%s2122_s21 + $0x398] sm:$0xff]  ;;  %457 = vst [vmem:[%s2118_s19 + $0x258] sm:$0xff] %v456_v11  ;;  %v462_v14 = vld [vmem:[%s2122_s21 + $0x3a8] sm:$0xff] }
  0x66   : >> { %459 = vst [vmem:[%s2118_s19 + $0x260] sm:$0xff] %v458_v12  ;;  %461 = vst [vmem:[%s2118_s19 + $0x268] sm:$0xff] %v460_v13  ;;  %v464_v15 = vld [vmem:[%s2122_s21 + $0x3b0] sm:$0xff]  ;;  %v466_v16 = vld [vmem:[%s2122_s21 + $0x3c0] sm:$0xff] }
  0x67   : >> { %463 = vst [vmem:[%s2118_s19 + $0x270] sm:$0xff] %v462_v14  ;;  %465 = vst [vmem:[%s2118_s19 + $0x278] sm:$0xff] %v464_v15  ;;  %v468_v17 = vld [vmem:[%s2122_s21 + $0x3c8] sm:$0xff]  ;;  %v470_v18 = vld [vmem:[%s2122_s21 + $0x3d8] sm:$0xff] }
  0x68   : >> { %467 = vst [vmem:[%s2118_s19 + $0x280] sm:$0xff] %v466_v16  ;;  %v472_v19 = vld [vmem:[%s2122_s21 + $0x3e0] sm:$0xff]  ;;  %469 = vst [vmem:[%s2118_s19 + $0x288] sm:$0xff] %v468_v17  ;;  %v474_v20 = vld [vmem:[%s2122_s21 + $0x3f0] sm:$0xff] }
  0x69   : >> { %471 = vst [vmem:[%s2118_s19 + $0x290] sm:$0xff] %v470_v18  ;;  %473 = vst [vmem:[%s2118_s19 + $0x298] sm:$0xff] %v472_v19  ;;  %v476_v21 = vld [vmem:[%s2122_s21 + $0x3f8] sm:$0xff]  ;;  %v478_v22 = vld [vmem:[%s2122_s21 + $0x408] sm:$0xff]  ;;  %302 = sbr.rel (!%p299_p4) target bundleno = 63 (0x3f), region = 162 }
  0x6a   : >> { %475 = vst [vmem:[%s2118_s19 + $0x2a0] sm:$0xff] %v474_v20  ;;  %477 = vst [vmem:[%s2118_s19 + $0x2a8] sm:$0xff] %v476_v21  ;;  %v480_v23 = vld [vmem:[%s2122_s21 + $0x410] sm:$0xff]  ;;  %v482_v24 = vld [vmem:[%s2122_s21 + $0x420] sm:$0xff] }
  0x6b   : >> { %479 = vst [vmem:[%s2118_s19 + $0x2b0] sm:$0xff] %v478_v22  ;;  %v484_v25 = vld [vmem:[%s2122_s21 + $0x428] sm:$0xff]  ;;  %481 = vst [vmem:[%s2118_s19 + $0x2b8] sm:$0xff] %v480_v23  ;;  %v486_v26 = vld [vmem:[%s2122_s21 + $0x438] sm:$0xff] }
  0x6c   : >> { %483 = vst [vmem:[%s2118_s19 + $0x2c0] sm:$0xff] %v482_v24  ;;  %485 = vst [vmem:[%s2118_s19 + $0x2c8] sm:$0xff] %v484_v25  ;;  %v488_v27 = vld [vmem:[%s2122_s21 + $0x440] sm:$0xff]  ;;  %v490_v28 = vld [vmem:[%s2122_s21 + $0x450] sm:$0xff] }
  0x6d   : >> { %487 = vst [vmem:[%s2118_s19 + $0x2d0] sm:$0xff] %v486_v26  ;;  %489 = vst [vmem:[%s2118_s19 + $0x2d8] sm:$0xff] %v488_v27  ;;  %v492_v29 = vld [vmem:[%s2122_s21 + $0x458] sm:$0xff]  ;;  %v494_v30 = vld [vmem:[%s2122_s21 + $0x468] sm:$0xff] }
  0x6e   : >> { %491 = vst [vmem:[%s2118_s19 + $0x2e0] sm:$0xff] %v490_v28  ;;  %v496_v31 = vld [vmem:[%s2122_s21 + $0x470] sm:$0xff]  ;;  %493 = vst [vmem:[%s2118_s19 + $0x2e8] sm:$0xff] %v492_v29  ;;  %s3662_s21 = smov %s2349_s29 }
  0x6f   : >> { %495 = vst [vmem:[%s2118_s19 + $0x2f0] sm:$0xff] %v494_v30  ;;  %497 = vst [vmem:[%s2118_s19 + $0x2f8] sm:$0xff] %v496_v31  ;;  %s3661_s19 = smov %s2352_s30 }
  0x70 PF: > { %s2522_s4 = sand.u32 1, %s293_s11   ;;  %s1675_s5 = sshll.u32 %s2282_s18, 8 }
  0x71   : > { %s509_s7 = sshra.s32 %s1675_s5, 4  ;;  %p1649_p6 = scmp.le.s32.totalorder %s2522_s4, 0 }
  0x72   : > { %s2526_s28 = scalar_lea.vmem %s2267_s6, %s509_s7   ;;  %s2529_s30 = scalar_lea.vmem %s2271_s9, %s509_s7 [#allocation2]  }
  0x73   : > { %1551 = sbr.rel (%p1649_p6) target bundleno = 147 (0x93), region = 167  ;;  %s3664_s19 = smov (!%p1649_p6), %s2529_s30 }
  0x74   : > { %s3665_s21 = smov (!%p1649_p6), %s2526_s28  ;;  %s2538_s23 = smov (!%p1649_p6), 0  }
  0x75   : > { %s2540_s26 = smov (!%p1649_p6), 0  }
  0x7a LB: >> { %v525_v32 = vld [vmem:[%s2138_s21] sm:$0xff]  ;;  %v527_v33 = vld [vmem:[%s2138_s21 + $0x18] sm:$0xff]  ;;  %v529_v34 = vld [vmem:[%s2138_s21 + $0x30] sm:$0xff]  ;;  %s621_s11 = sadd.s32 1, %s2142_s23  ;;  %s519_s26 = sadd.s32 1, %s2146_s26   ;;  %s2146_s26 = sphi %s2540_s26, %s519_s26   ;;  %s2142_s23 = sphi %s2538_s23, %s3668_s23   ;;  %s2138_s21 = sphi %s3665_s21, %s3667_s21   ;;  %s2134_s19 = sphi %s3664_s19, %s3666_s19  }
  0x7b   : >> { %526 = vst [vmem:[%s2134_s19] sm:$0xff] %v525_v32  ;;  %528 = vst [vmem:[%s2134_s19 + $0x10] sm:$0xff] %v527_v33  ;;  %v531_v35 = vld [vmem:[%s2138_s21 + $0x48] sm:$0xff]  ;;  %v533_v36 = vld [vmem:[%s2138_s21 + $0x60] sm:$0xff]  ;;  %p622_p7 = scmp.ge.s32.totalorder %s621_s11, %s2522_s4  ;;  %p518_p8 = scmp.ge.s32.totalorder %s519_s26, %s2522_s4 }
  0x7c   : >> { %530 = vst [vmem:[%s2134_s19 + $0x20] sm:$0xff] %v529_v34  ;;  %v535_v37 = vld [vmem:[%s2138_s21 + $0x78] sm:$0xff]  ;;  %532 = vst [vmem:[%s2134_s19 + $0x30] sm:$0xff] %v531_v35  ;;  %v537_v38 = vld [vmem:[%s2138_s21 + $0x90] sm:$0xff] }
  0x7d   : >> { %534 = vst [vmem:[%s2134_s19 + $0x40] sm:$0xff] %v533_v36  ;;  %536 = vst [vmem:[%s2134_s19 + $0x50] sm:$0xff] %v535_v37  ;;  %v539_v39 = vld [vmem:[%s2138_s21 + $0xa8] sm:$0xff]  ;;  %v541_v40 = vld [vmem:[%s2138_s21 + $0xc0] sm:$0xff]  ;;  %s3692_s11 = smov (%p622_p7, %s621_s11), 0 }
  0x7e   : >> { %538 = vst [vmem:[%s2134_s19 + $0x60] sm:$0xff] %v537_v38  ;;  %540 = vst [vmem:[%s2134_s19 + $0x70] sm:$0xff] %v539_v39  ;;  %v543_v41 = vld [vmem:[%s2138_s21 + $0xd8] sm:$0xff]  ;;  %v545_v42 = vld [vmem:[%s2138_s21 + $0xf0] sm:$0xff]  ;;  %s1650_s18 = sshll.u32 %s3692_s11, 3  ;;  %s3668_s23 = smov %s3692_s11 }
  0x7f   : >> { %542 = vst [vmem:[%s2134_s19 + $0x80] sm:$0xff] %v541_v40  ;;  %v547_v43 = vld [vmem:[%s2138_s21 + $0x108] sm:$0xff]  ;;  %544 = vst [vmem:[%s2134_s19 + $0x90] sm:$0xff] %v543_v41  ;;  %v549_v44 = vld [vmem:[%s2138_s21 + $0x120] sm:$0xff]  ;;  %s2596_s27 = scalar_lea.vmem %s2526_s28, %s1650_s18   ;;  %s2599_s29 = scalar_lea.vmem %s2529_s30, %s1650_s18 [#allocation2]  }
  0x80   : >> { %546 = vst [vmem:[%s2134_s19 + $0xa0] sm:$0xff] %v545_v42  ;;  %548 = vst [vmem:[%s2134_s19 + $0xb0] sm:$0xff] %v547_v43  ;;  %v551_v45 = vld [vmem:[%s2138_s21 + $0x138] sm:$0xff]  ;;  %v553_v46 = vld [vmem:[%s2138_s21 + $0x150] sm:$0xff] }
  0x81   : >> { %550 = vst [vmem:[%s2134_s19 + $0xc0] sm:$0xff] %v549_v44  ;;  %552 = vst [vmem:[%s2134_s19 + $0xd0] sm:$0xff] %v551_v45  ;;  %v555_v47 = vld [vmem:[%s2138_s21 + $0x168] sm:$0xff]  ;;  %v557_v48 = vld [vmem:[%s2138_s21 + $0x180] sm:$0xff] }
  0x82   : >> { %554 = vst [vmem:[%s2134_s19 + $0xe0] sm:$0xff] %v553_v46  ;;  %v559_v49 = vld [vmem:[%s2138_s21 + $0x198] sm:$0xff]  ;;  %556 = vst [vmem:[%s2134_s19 + $0xf0] sm:$0xff] %v555_v47  ;;  %v561_v50 = vld [vmem:[%s2138_s21 + $0x1b0] sm:$0xff] }
  0x83   : >> { %558 = vst [vmem:[%s2134_s19 + $0x100] sm:$0xff] %v557_v48  ;;  %560 = vst [vmem:[%s2134_s19 + $0x110] sm:$0xff] %v559_v49  ;;  %v563_v51 = vld [vmem:[%s2138_s21 + $0x1c8] sm:$0xff]  ;;  %v565_v52 = vld [vmem:[%s2138_s21 + $0x1e0] sm:$0xff] }
  0x84   : >> { %562 = vst [vmem:[%s2134_s19 + $0x120] sm:$0xff] %v561_v50  ;;  %564 = vst [vmem:[%s2134_s19 + $0x130] sm:$0xff] %v563_v51  ;;  %v567_v53 = vld [vmem:[%s2138_s21 + $0x1f8] sm:$0xff]  ;;  %v569_v54 = vld [vmem:[%s2138_s21 + $0x210] sm:$0xff] }
  0x85   : >> { %566 = vst [vmem:[%s2134_s19 + $0x140] sm:$0xff] %v565_v52  ;;  %v571_v55 = vld [vmem:[%s2138_s21 + $0x228] sm:$0xff]  ;;  %568 = vst [vmem:[%s2134_s19 + $0x150] sm:$0xff] %v567_v53  ;;  %v573_v56 = vld [vmem:[%s2138_s21 + $0x240] sm:$0xff] }
  0x86   : >> { %570 = vst [vmem:[%s2134_s19 + $0x160] sm:$0xff] %v569_v54  ;;  %572 = vst [vmem:[%s2134_s19 + $0x170] sm:$0xff] %v571_v55  ;;  %v575_v57 = vld [vmem:[%s2138_s21 + $0x258] sm:$0xff]  ;;  %v577_v58 = vld [vmem:[%s2138_s21 + $0x270] sm:$0xff] }
  0x87   : >> { %574 = vst [vmem:[%s2134_s19 + $0x180] sm:$0xff] %v573_v56  ;;  %576 = vst [vmem:[%s2134_s19 + $0x190] sm:$0xff] %v575_v57  ;;  %v579_v59 = vld [vmem:[%s2138_s21 + $0x288] sm:$0xff]  ;;  %v581_v60 = vld [vmem:[%s2138_s21 + $0x2a0] sm:$0xff] }
  0x88   : >> { %578 = vst [vmem:[%s2134_s19 + $0x1a0] sm:$0xff] %v577_v58  ;;  %v583_v61 = vld [vmem:[%s2138_s21 + $0x2b8] sm:$0xff]  ;;  %580 = vst [vmem:[%s2134_s19 + $0x1b0] sm:$0xff] %v579_v59  ;;  %v585_v62 = vld [vmem:[%s2138_s21 + $0x2d0] sm:$0xff] }
  0x89   : >> { %582 = vst [vmem:[%s2134_s19 + $0x1c0] sm:$0xff] %v581_v60  ;;  %584 = vst [vmem:[%s2134_s19 + $0x1d0] sm:$0xff] %v583_v61  ;;  %v587_v63 = vld [vmem:[%s2138_s21 + $0x2e8] sm:$0xff]  ;;  %v589_v0 = vld [vmem:[%s2138_s21 + $0x300] sm:$0xff] }
  0x8a   : >> { %586 = vst [vmem:[%s2134_s19 + $0x1e0] sm:$0xff] %v585_v62  ;;  %588 = vst [vmem:[%s2134_s19 + $0x1f0] sm:$0xff] %v587_v63  ;;  %v591_v1 = vld [vmem:[%s2138_s21 + $0x318] sm:$0xff]  ;;  %v593_v2 = vld [vmem:[%s2138_s21 + $0x330] sm:$0xff] }
  0x8b   : >> { %590 = vst [vmem:[%s2134_s19 + $0x200] sm:$0xff] %v589_v0  ;;  %v595_v3 = vld [vmem:[%s2138_s21 + $0x348] sm:$0xff]  ;;  %592 = vst [vmem:[%s2134_s19 + $0x210] sm:$0xff] %v591_v1  ;;  %v597_v4 = vld [vmem:[%s2138_s21 + $0x360] sm:$0xff] }
  0x8c   : >> { %594 = vst [vmem:[%s2134_s19 + $0x220] sm:$0xff] %v593_v2  ;;  %596 = vst [vmem:[%s2134_s19 + $0x230] sm:$0xff] %v595_v3  ;;  %v599_v5 = vld [vmem:[%s2138_s21 + $0x378] sm:$0xff]  ;;  %v601_v6 = vld [vmem:[%s2138_s21 + $0x390] sm:$0xff]  ;;  %521 = sbr.rel (!%p518_p8) target bundleno = 122 (0x7a), region = 173 }
  0x8d   : >> { %598 = vst [vmem:[%s2134_s19 + $0x240] sm:$0xff] %v597_v4  ;;  %600 = vst [vmem:[%s2134_s19 + $0x250] sm:$0xff] %v599_v5  ;;  %v603_v7 = vld [vmem:[%s2138_s21 + $0x3a8] sm:$0xff]  ;;  %v605_v8 = vld [vmem:[%s2138_s21 + $0x3c0] sm:$0xff] }
  0x8e   : >> { %602 = vst [vmem:[%s2134_s19 + $0x260] sm:$0xff] %v601_v6  ;;  %v607_v9 = vld [vmem:[%s2138_s21 + $0x3d8] sm:$0xff]  ;;  %604 = vst [vmem:[%s2134_s19 + $0x270] sm:$0xff] %v603_v7  ;;  %v609_v10 = vld [vmem:[%s2138_s21 + $0x3f0] sm:$0xff] }
  0x8f   : >> { %606 = vst [vmem:[%s2134_s19 + $0x280] sm:$0xff] %v605_v8  ;;  %608 = vst [vmem:[%s2134_s19 + $0x290] sm:$0xff] %v607_v9  ;;  %v611_v11 = vld [vmem:[%s2138_s21 + $0x408] sm:$0xff]  ;;  %v613_v12 = vld [vmem:[%s2138_s21 + $0x420] sm:$0xff] }
  0x90   : >> { %610 = vst [vmem:[%s2134_s19 + $0x2a0] sm:$0xff] %v609_v10  ;;  %612 = vst [vmem:[%s2134_s19 + $0x2b0] sm:$0xff] %v611_v11  ;;  %v615_v13 = vld [vmem:[%s2138_s21 + $0x438] sm:$0xff]  ;;  %v617_v14 = vld [vmem:[%s2138_s21 + $0x450] sm:$0xff] }
  0x91   : >> { %614 = vst [vmem:[%s2134_s19 + $0x2c0] sm:$0xff] %v613_v12  ;;  %v619_v15 = vld [vmem:[%s2138_s21 + $0x468] sm:$0xff]  ;;  %616 = vst [vmem:[%s2134_s19 + $0x2d0] sm:$0xff] %v615_v13  ;;  %s3667_s21 = smov %s2596_s27 }
  0x92   : >> { %618 = vst [vmem:[%s2134_s19 + $0x2e0] sm:$0xff] %v617_v14  ;;  %620 = vst [vmem:[%s2134_s19 + $0x2f0] sm:$0xff] %v619_v15  ;;  %s3666_s19 = smov %s2599_s29 }
  0x93 PF: > { %630 = sbr.rel (%p289_p0) target bundleno = 295 (0x127), region = 65  ;;  %s632_s5 = ssub.s32 (!%p289_p0), %s2269_s8, %s2275_s10 }
  0x94   : > { %s636_s7 = sshrl.u32 (!%p289_p0), %s2269_s8, 3  ;;  %s2677_s18 = scalar_lea.vmem (!%p289_p0), %s2267_s6, %s632_s5 }
  0x95   : > { %s2680_s27 = scalar_lea.vmem (!%p289_p0), %s2271_s9, %s632_s5 [#allocation2]  ;;  %s2684_s26 = sshrl.u32 (!%p289_p0), %s636_s7, 1 }
  0x96   : > { %p1652_p11 = scmp.le.s32.totalorder (!%p289_p0), %s2684_s26, 0 }
  0x9a   : > { %1565 = sbr.rel (%p1652_p11) target bundleno = 210 (0xd2), region = 178  ;;  %s3669_s4 = smov (!%p1652_p11), %s2271_s9 }
  0x9b   : > { %s3670_s28 = smov (!%p1652_p11), %s2267_s6  ;;  %s2693_s30 = smov (!%p1652_p11), 0  }
  0x9c   : > { %s2695_s19 = smov (!%p1652_p11), 0  }
  0xa1 LB: >> { %v649_v16 = vld [vmem:[%s2154_s28] sm:$0xff]  ;;  %v651_v17 = vld [vmem:[%s2154_s28 + $0x8] sm:$0xff]  ;;  %v653_v18 = vld [vmem:[%s2154_s28 + $0x18] sm:$0xff]  ;;  %s841_s21 = sadd.s32 1, %s2158_s30  ;;  %s643_s19 = sadd.s32 1, %s2162_s19   ;;  %s2162_s19 = sphi %s2695_s19, %s643_s19   ;;  %s2158_s30 = sphi %s2693_s30, %s3673_s30   ;;  %s2154_s28 = sphi %s3670_s28, %s3672_s28   ;;  %s2150_s4 = sphi %s3669_s4, %s3671_s4  }
  0xa2   : >> { %650 = vst [vmem:[%s2150_s4] sm:$0xff] %v649_v16  ;;  %652 = vst [vmem:[%s2150_s4 + $0x8] sm:$0xff] %v651_v17  ;;  %v655_v19 = vld [vmem:[%s2154_s28 + $0x20] sm:$0xff]  ;;  %v657_v20 = vld [vmem:[%s2154_s28 + $0x30] sm:$0xff]  ;;  %p842_p12 = scmp.ge.s32.totalorder %s841_s21, %s2684_s26  ;;  %p642_p13 = scmp.ge.s32.totalorder %s643_s19, %s2684_s26 }
  0xa3   : >> { %654 = vst [vmem:[%s2150_s4 + $0x10] sm:$0xff] %v653_v18  ;;  %v659_v21 = vld [vmem:[%s2154_s28 + $0x38] sm:$0xff]  ;;  %656 = vst [vmem:[%s2150_s4 + $0x18] sm:$0xff] %v655_v19  ;;  %v661_v22 = vld [vmem:[%s2154_s28 + $0x48] sm:$0xff] }
  0xa4   : >> { %658 = vst [vmem:[%s2150_s4 + $0x20] sm:$0xff] %v657_v20  ;;  %660 = vst [vmem:[%s2150_s4 + $0x28] sm:$0xff] %v659_v21  ;;  %v663_v23 = vld [vmem:[%s2154_s28 + $0x50] sm:$0xff]  ;;  %v665_v24 = vld [vmem:[%s2154_s28 + $0x60] sm:$0xff]  ;;  %s3694_s21 = smov (%p842_p12, %s841_s21), 0 }
  0xa5   : >> { %662 = vst [vmem:[%s2150_s4 + $0x30] sm:$0xff] %v661_v22  ;;  %664 = vst [vmem:[%s2150_s4 + $0x38] sm:$0xff] %v663_v23  ;;  %v667_v25 = vld [vmem:[%s2154_s28 + $0x68] sm:$0xff]  ;;  %v669_v26 = vld [vmem:[%s2154_s28 + $0x78] sm:$0xff]  ;;  %s1653_s23 = sshll.u32 %s3694_s21, 4  ;;  %s3673_s30 = smov %s3694_s21 }
  0xa6   : >> { %666 = vst [vmem:[%s2150_s4 + $0x40] sm:$0xff] %v665_v24  ;;  %v671_v27 = vld [vmem:[%s2154_s28 + $0x80] sm:$0xff]  ;;  %668 = vst [vmem:[%s2150_s4 + $0x48] sm:$0xff] %v667_v25  ;;  %v673_v28 = vld [vmem:[%s2154_s28 + $0x90] sm:$0xff]  ;;  %s2751_s11 = scalar_lea.vmem %s2267_s6, %s1653_s23   ;;  %s2754_s29 = scalar_lea.vmem %s2271_s9, %s1653_s23 [#allocation2]  }
  0xa7   : >> { %670 = vst [vmem:[%s2150_s4 + $0x50] sm:$0xff] %v669_v26  ;;  %672 = vst [vmem:[%s2150_s4 + $0x58] sm:$0xff] %v671_v27  ;;  %v675_v29 = vld [vmem:[%s2154_s28 + $0x98] sm:$0xff]  ;;  %v677_v30 = vld [vmem:[%s2154_s28 + $0xa8] sm:$0xff] }
  0xa8   : >> { %674 = vst [vmem:[%s2150_s4 + $0x60] sm:$0xff] %v673_v28  ;;  %676 = vst [vmem:[%s2150_s4 + $0x68] sm:$0xff] %v675_v29  ;;  %v679_v31 = vld [vmem:[%s2154_s28 + $0xb0] sm:$0xff]  ;;  %v681_v32 = vld [vmem:[%s2154_s28 + $0xc0] sm:$0xff] }
  0xa9   : >> { %678 = vst [vmem:[%s2150_s4 + $0x70] sm:$0xff] %v677_v30  ;;  %v683_v33 = vld [vmem:[%s2154_s28 + $0xc8] sm:$0xff]  ;;  %680 = vst [vmem:[%s2150_s4 + $0x78] sm:$0xff] %v679_v31  ;;  %v685_v34 = vld [vmem:[%s2154_s28 + $0xd8] sm:$0xff] }
  0xaa   : >> { %682 = vst [vmem:[%s2150_s4 + $0x80] sm:$0xff] %v681_v32  ;;  %684 = vst [vmem:[%s2150_s4 + $0x88] sm:$0xff] %v683_v33  ;;  %v687_v35 = vld [vmem:[%s2154_s28 + $0xe0] sm:$0xff]  ;;  %v689_v36 = vld [vmem:[%s2154_s28 + $0xf0] sm:$0xff] }
  0xab   : >> { %686 = vst [vmem:[%s2150_s4 + $0x90] sm:$0xff] %v685_v34  ;;  %688 = vst [vmem:[%s2150_s4 + $0x98] sm:$0xff] %v687_v35  ;;  %v691_v37 = vld [vmem:[%s2154_s28 + $0xf8] sm:$0xff]  ;;  %v693_v38 = vld [vmem:[%s2154_s28 + $0x108] sm:$0xff] }
  0xac   : >> { %690 = vst [vmem:[%s2150_s4 + $0xa0] sm:$0xff] %v689_v36  ;;  %v695_v39 = vld [vmem:[%s2154_s28 + $0x110] sm:$0xff]  ;;  %692 = vst [vmem:[%s2150_s4 + $0xa8] sm:$0xff] %v691_v37  ;;  %v697_v40 = vld [vmem:[%s2154_s28 + $0x120] sm:$0xff] }
  0xad   : >> { %694 = vst [vmem:[%s2150_s4 + $0xb0] sm:$0xff] %v693_v38  ;;  %696 = vst [vmem:[%s2150_s4 + $0xb8] sm:$0xff] %v695_v39  ;;  %v699_v41 = vld [vmem:[%s2154_s28 + $0x128] sm:$0xff]  ;;  %v701_v42 = vld [vmem:[%s2154_s28 + $0x138] sm:$0xff] }
  0xae   : >> { %698 = vst [vmem:[%s2150_s4 + $0xc0] sm:$0xff] %v697_v40  ;;  %700 = vst [vmem:[%s2150_s4 + $0xc8] sm:$0xff] %v699_v41  ;;  %v703_v43 = vld [vmem:[%s2154_s28 + $0x140] sm:$0xff]  ;;  %v705_v44 = vld [vmem:[%s2154_s28 + $0x150] sm:$0xff] }
  0xaf   : >> { %702 = vst [vmem:[%s2150_s4 + $0xd0] sm:$0xff] %v701_v42  ;;  %v707_v45 = vld [vmem:[%s2154_s28 + $0x158] sm:$0xff]  ;;  %704 = vst [vmem:[%s2150_s4 + $0xd8] sm:$0xff] %v703_v43  ;;  %v709_v46 = vld [vmem:[%s2154_s28 + $0x168] sm:$0xff] }
  0xb0   : >> { %706 = vst [vmem:[%s2150_s4 + $0xe0] sm:$0xff] %v705_v44  ;;  %708 = vst [vmem:[%s2150_s4 + $0xe8] sm:$0xff] %v707_v45  ;;  %v711_v47 = vld [vmem:[%s2154_s28 + $0x170] sm:$0xff]  ;;  %v713_v48 = vld [vmem:[%s2154_s28 + $0x180] sm:$0xff] }
  0xb1   : >> { %710 = vst [vmem:[%s2150_s4 + $0xf0] sm:$0xff] %v709_v46  ;;  %712 = vst [vmem:[%s2150_s4 + $0xf8] sm:$0xff] %v711_v47  ;;  %v715_v49 = vld [vmem:[%s2154_s28 + $0x188] sm:$0xff]  ;;  %v717_v50 = vld [vmem:[%s2154_s28 + $0x198] sm:$0xff] }
  0xb2   : >> { %714 = vst [vmem:[%s2150_s4 + $0x100] sm:$0xff] %v713_v48  ;;  %v719_v51 = vld [vmem:[%s2154_s28 + $0x1a0] sm:$0xff]  ;;  %716 = vst [vmem:[%s2150_s4 + $0x108] sm:$0xff] %v715_v49  ;;  %v721_v52 = vld [vmem:[%s2154_s28 + $0x1b0] sm:$0xff] }
  0xb3   : >> { %718 = vst [vmem:[%s2150_s4 + $0x110] sm:$0xff] %v717_v50  ;;  %720 = vst [vmem:[%s2150_s4 + $0x118] sm:$0xff] %v719_v51  ;;  %v723_v53 = vld [vmem:[%s2154_s28 + $0x1b8] sm:$0xff]  ;;  %v725_v54 = vld [vmem:[%s2154_s28 + $0x1c8] sm:$0xff] }
  0xb4   : >> { %722 = vst [vmem:[%s2150_s4 + $0x120] sm:$0xff] %v721_v52  ;;  %724 = vst [vmem:[%s2150_s4 + $0x128] sm:$0xff] %v723_v53  ;;  %v727_v55 = vld [vmem:[%s2154_s28 + $0x1d0] sm:$0xff]  ;;  %v729_v56 = vld [vmem:[%s2154_s28 + $0x1e0] sm:$0xff] }
  0xb5   : >> { %726 = vst [vmem:[%s2150_s4 + $0x130] sm:$0xff] %v725_v54  ;;  %v731_v57 = vld [vmem:[%s2154_s28 + $0x1e8] sm:$0xff]  ;;  %728 = vst [vmem:[%s2150_s4 + $0x138] sm:$0xff] %v727_v55  ;;  %v733_v58 = vld [vmem:[%s2154_s28 + $0x1f8] sm:$0xff] }
  0xb6   : >> { %730 = vst [vmem:[%s2150_s4 + $0x140] sm:$0xff] %v729_v56  ;;  %732 = vst [vmem:[%s2150_s4 + $0x148] sm:$0xff] %v731_v57  ;;  %v735_v59 = vld [vmem:[%s2154_s28 + $0x200] sm:$0xff]  ;;  %v737_v60 = vld [vmem:[%s2154_s28 + $0x210] sm:$0xff] }
  0xb7   : >> { %734 = vst [vmem:[%s2150_s4 + $0x150] sm:$0xff] %v733_v58  ;;  %736 = vst [vmem:[%s2150_s4 + $0x158] sm:$0xff] %v735_v59  ;;  %v739_v61 = vld [vmem:[%s2154_s28 + $0x218] sm:$0xff]  ;;  %v741_v62 = vld [vmem:[%s2154_s28 + $0x228] sm:$0xff] }
  0xb8   : >> { %738 = vst [vmem:[%s2150_s4 + $0x160] sm:$0xff] %v737_v60  ;;  %v743_v63 = vld [vmem:[%s2154_s28 + $0x230] sm:$0xff]  ;;  %740 = vst [vmem:[%s2150_s4 + $0x168] sm:$0xff] %v739_v61  ;;  %v745_v0 = vld [vmem:[%s2154_s28 + $0x240] sm:$0xff] }
  0xb9   : >> { %742 = vst [vmem:[%s2150_s4 + $0x170] sm:$0xff] %v741_v62  ;;  %744 = vst [vmem:[%s2150_s4 + $0x178] sm:$0xff] %v743_v63  ;;  %v747_v1 = vld [vmem:[%s2154_s28 + $0x248] sm:$0xff]  ;;  %v749_v2 = vld [vmem:[%s2154_s28 + $0x258] sm:$0xff] }
  0xba   : >> { %746 = vst [vmem:[%s2150_s4 + $0x180] sm:$0xff] %v745_v0  ;;  %748 = vst [vmem:[%s2150_s4 + $0x188] sm:$0xff] %v747_v1  ;;  %v751_v3 = vld [vmem:[%s2154_s28 + $0x260] sm:$0xff]  ;;  %v753_v4 = vld [vmem:[%s2154_s28 + $0x270] sm:$0xff] }
  0xbb   : >> { %750 = vst [vmem:[%s2150_s4 + $0x190] sm:$0xff] %v749_v2  ;;  %v755_v5 = vld [vmem:[%s2154_s28 + $0x278] sm:$0xff]  ;;  %752 = vst [vmem:[%s2150_s4 + $0x198] sm:$0xff] %v751_v3  ;;  %v757_v6 = vld [vmem:[%s2154_s28 + $0x288] sm:$0xff] }
  0xbc   : >> { %754 = vst [vmem:[%s2150_s4 + $0x1a0] sm:$0xff] %v753_v4  ;;  %756 = vst [vmem:[%s2150_s4 + $0x1a8] sm:$0xff] %v755_v5  ;;  %v759_v7 = vld [vmem:[%s2154_s28 + $0x290] sm:$0xff]  ;;  %v761_v8 = vld [vmem:[%s2154_s28 + $0x2a0] sm:$0xff] }
  0xbd   : >> { %758 = vst [vmem:[%s2150_s4 + $0x1b0] sm:$0xff] %v757_v6  ;;  %760 = vst [vmem:[%s2150_s4 + $0x1b8] sm:$0xff] %v759_v7  ;;  %v763_v9 = vld [vmem:[%s2154_s28 + $0x2a8] sm:$0xff]  ;;  %v765_v10 = vld [vmem:[%s2154_s28 + $0x2b8] sm:$0xff] }
  0xbe   : >> { %762 = vst [vmem:[%s2150_s4 + $0x1c0] sm:$0xff] %v761_v8  ;;  %v767_v11 = vld [vmem:[%s2154_s28 + $0x2c0] sm:$0xff]  ;;  %764 = vst [vmem:[%s2150_s4 + $0x1c8] sm:$0xff] %v763_v9  ;;  %v769_v12 = vld [vmem:[%s2154_s28 + $0x2d0] sm:$0xff] }
  0xbf   : >> { %766 = vst [vmem:[%s2150_s4 + $0x1d0] sm:$0xff] %v765_v10  ;;  %768 = vst [vmem:[%s2150_s4 + $0x1d8] sm:$0xff] %v767_v11  ;;  %v771_v13 = vld [vmem:[%s2154_s28 + $0x2d8] sm:$0xff]  ;;  %v773_v14 = vld [vmem:[%s2154_s28 + $0x2e8] sm:$0xff] }
  0xc0   : >> { %770 = vst [vmem:[%s2150_s4 + $0x1e0] sm:$0xff] %v769_v12  ;;  %772 = vst [vmem:[%s2150_s4 + $0x1e8] sm:$0xff] %v771_v13  ;;  %v775_v15 = vld [vmem:[%s2154_s28 + $0x2f0] sm:$0xff]  ;;  %v777_v16 = vld [vmem:[%s2154_s28 + $0x300] sm:$0xff] }
  0xc1   : >> { %774 = vst [vmem:[%s2150_s4 + $0x1f0] sm:$0xff] %v773_v14  ;;  %v779_v17 = vld [vmem:[%s2154_s28 + $0x308] sm:$0xff]  ;;  %776 = vst [vmem:[%s2150_s4 + $0x1f8] sm:$0xff] %v775_v15  ;;  %v781_v18 = vld [vmem:[%s2154_s28 + $0x318] sm:$0xff] }
  0xc2   : >> { %778 = vst [vmem:[%s2150_s4 + $0x200] sm:$0xff] %v777_v16  ;;  %780 = vst [vmem:[%s2150_s4 + $0x208] sm:$0xff] %v779_v17  ;;  %v783_v19 = vld [vmem:[%s2154_s28 + $0x320] sm:$0xff]  ;;  %v785_v20 = vld [vmem:[%s2154_s28 + $0x330] sm:$0xff] }
  0xc3   : >> { %782 = vst [vmem:[%s2150_s4 + $0x210] sm:$0xff] %v781_v18  ;;  %784 = vst [vmem:[%s2150_s4 + $0x218] sm:$0xff] %v783_v19  ;;  %v787_v21 = vld [vmem:[%s2154_s28 + $0x338] sm:$0xff]  ;;  %v789_v22 = vld [vmem:[%s2154_s28 + $0x348] sm:$0xff] }
  0xc4   : >> { %786 = vst [vmem:[%s2150_s4 + $0x220] sm:$0xff] %v785_v20  ;;  %v791_v23 = vld [vmem:[%s2154_s28 + $0x350] sm:$0xff]  ;;  %788 = vst [vmem:[%s2150_s4 + $0x228] sm:$0xff] %v787_v21  ;;  %v793_v24 = vld [vmem:[%s2154_s28 + $0x360] sm:$0xff] }
  0xc5   : >> { %790 = vst [vmem:[%s2150_s4 + $0x230] sm:$0xff] %v789_v22  ;;  %792 = vst [vmem:[%s2150_s4 + $0x238] sm:$0xff] %v791_v23  ;;  %v795_v25 = vld [vmem:[%s2154_s28 + $0x368] sm:$0xff]  ;;  %v797_v26 = vld [vmem:[%s2154_s28 + $0x378] sm:$0xff] }
  0xc6   : >> { %794 = vst [vmem:[%s2150_s4 + $0x240] sm:$0xff] %v793_v24  ;;  %796 = vst [vmem:[%s2150_s4 + $0x248] sm:$0xff] %v795_v25  ;;  %v799_v27 = vld [vmem:[%s2154_s28 + $0x380] sm:$0xff]  ;;  %v801_v28 = vld [vmem:[%s2154_s28 + $0x390] sm:$0xff] }
  0xc7   : >> { %798 = vst [vmem:[%s2150_s4 + $0x250] sm:$0xff] %v797_v26  ;;  %v803_v29 = vld [vmem:[%s2154_s28 + $0x398] sm:$0xff]  ;;  %800 = vst [vmem:[%s2150_s4 + $0x258] sm:$0xff] %v799_v27  ;;  %v805_v30 = vld [vmem:[%s2154_s28 + $0x3a8] sm:$0xff] }
  0xc8   : >> { %802 = vst [vmem:[%s2150_s4 + $0x260] sm:$0xff] %v801_v28  ;;  %804 = vst [vmem:[%s2150_s4 + $0x268] sm:$0xff] %v803_v29  ;;  %v807_v31 = vld [vmem:[%s2154_s28 + $0x3b0] sm:$0xff]  ;;  %v809_v32 = vld [vmem:[%s2154_s28 + $0x3c0] sm:$0xff] }
  0xc9   : >> { %806 = vst [vmem:[%s2150_s4 + $0x270] sm:$0xff] %v805_v30  ;;  %808 = vst [vmem:[%s2150_s4 + $0x278] sm:$0xff] %v807_v31  ;;  %v811_v33 = vld [vmem:[%s2154_s28 + $0x3c8] sm:$0xff]  ;;  %v813_v34 = vld [vmem:[%s2154_s28 + $0x3d8] sm:$0xff] }
  0xca   : >> { %810 = vst [vmem:[%s2150_s4 + $0x280] sm:$0xff] %v809_v32  ;;  %v815_v35 = vld [vmem:[%s2154_s28 + $0x3e0] sm:$0xff]  ;;  %812 = vst [vmem:[%s2150_s4 + $0x288] sm:$0xff] %v811_v33  ;;  %v817_v36 = vld [vmem:[%s2154_s28 + $0x3f0] sm:$0xff] }
  0xcb   : >> { %814 = vst [vmem:[%s2150_s4 + $0x290] sm:$0xff] %v813_v34  ;;  %816 = vst [vmem:[%s2150_s4 + $0x298] sm:$0xff] %v815_v35  ;;  %v819_v37 = vld [vmem:[%s2154_s28 + $0x3f8] sm:$0xff]  ;;  %v821_v38 = vld [vmem:[%s2154_s28 + $0x408] sm:$0xff]  ;;  %645 = sbr.rel (!%p642_p13) target bundleno = 161 (0xa1), region = 184 }
  0xcc   : >> { %818 = vst [vmem:[%s2150_s4 + $0x2a0] sm:$0xff] %v817_v36  ;;  %820 = vst [vmem:[%s2150_s4 + $0x2a8] sm:$0xff] %v819_v37  ;;  %v823_v39 = vld [vmem:[%s2154_s28 + $0x410] sm:$0xff]  ;;  %v825_v40 = vld [vmem:[%s2154_s28 + $0x420] sm:$0xff] }
  0xcd   : >> { %822 = vst [vmem:[%s2150_s4 + $0x2b0] sm:$0xff] %v821_v38  ;;  %v827_v41 = vld [vmem:[%s2154_s28 + $0x428] sm:$0xff]  ;;  %824 = vst [vmem:[%s2150_s4 + $0x2b8] sm:$0xff] %v823_v39  ;;  %v829_v42 = vld [vmem:[%s2154_s28 + $0x438] sm:$0xff] }
  0xce   : >> { %826 = vst [vmem:[%s2150_s4 + $0x2c0] sm:$0xff] %v825_v40  ;;  %828 = vst [vmem:[%s2150_s4 + $0x2c8] sm:$0xff] %v827_v41  ;;  %v831_v43 = vld [vmem:[%s2154_s28 + $0x440] sm:$0xff]  ;;  %v833_v44 = vld [vmem:[%s2154_s28 + $0x450] sm:$0xff] }
  0xcf   : >> { %830 = vst [vmem:[%s2150_s4 + $0x2d0] sm:$0xff] %v829_v42  ;;  %832 = vst [vmem:[%s2150_s4 + $0x2d8] sm:$0xff] %v831_v43  ;;  %v835_v45 = vld [vmem:[%s2154_s28 + $0x458] sm:$0xff]  ;;  %v837_v46 = vld [vmem:[%s2154_s28 + $0x468] sm:$0xff] }
  0xd0   : >> { %834 = vst [vmem:[%s2150_s4 + $0x2e0] sm:$0xff] %v833_v44  ;;  %v839_v47 = vld [vmem:[%s2154_s28 + $0x470] sm:$0xff]  ;;  %836 = vst [vmem:[%s2150_s4 + $0x2e8] sm:$0xff] %v835_v45  ;;  %s3672_s28 = smov %s2751_s11 }
  0xd1   : >> { %838 = vst [vmem:[%s2150_s4 + $0x2f0] sm:$0xff] %v837_v46  ;;  %840 = vst [vmem:[%s2150_s4 + $0x2f8] sm:$0xff] %v839_v47  ;;  %s3671_s4 = smov %s2754_s29 }
  0xd2 PF: > { %s2924_s5 = sand.u32 1, %s636_s7   ;;  %s1677_s23 = sshll.u32 %s2684_s26, 8 }
  0xd3   : > { %s852_s1 = sshra.s32 %s1677_s23, 4  ;;  %p1658_p0 = scmp.le.s32.totalorder %s2924_s5, 0 }
  0xd4   : > { %s2928_s20 = scalar_lea.vmem %s2267_s6, %s852_s1   ;;  %s2931_s29 = scalar_lea.vmem %s2271_s9, %s852_s1 [#allocation2]  }
  0xd5   : > { %1579 = sbr.rel (%p1658_p0) target bundleno = 245 (0xf5), region = 189  ;;  %s3674_s4 = smov (!%p1658_p0), %s2931_s29 }
  0xd6   : > { %s3675_s28 = smov (!%p1658_p0), %s2928_s20  ;;  %s2940_s30 = smov (!%p1658_p0), 0  }
  0xd7   : > { %s2942_s19 = smov (!%p1658_p0), 0  }
  0xdc LB: >> { %v868_v48 = vld [vmem:[%s2170_s28] sm:$0xff]  ;;  %v870_v49 = vld [vmem:[%s2170_s28 + $0x18] sm:$0xff]  ;;  %v872_v50 = vld [vmem:[%s2170_s28 + $0x30] sm:$0xff]  ;;  %s964_s1 = sadd.s32 1, %s2174_s30  ;;  %s862_s19 = sadd.s32 1, %s2178_s19   ;;  %s2178_s19 = sphi %s2942_s19, %s862_s19   ;;  %s2174_s30 = sphi %s2940_s30, %s3678_s30   ;;  %s2170_s28 = sphi %s3675_s28, %s3677_s28   ;;  %s2166_s4 = sphi %s3674_s4, %s3676_s4  }
  0xdd   : >> { %869 = vst [vmem:[%s2166_s4] sm:$0xff] %v868_v48  ;;  %871 = vst [vmem:[%s2166_s4 + $0x10] sm:$0xff] %v870_v49  ;;  %v874_v51 = vld [vmem:[%s2170_s28 + $0x48] sm:$0xff]  ;;  %v876_v52 = vld [vmem:[%s2170_s28 + $0x60] sm:$0xff]  ;;  %p965_p1 = scmp.ge.s32.totalorder %s964_s1, %s2924_s5  ;;  %p861_p2 = scmp.ge.s32.totalorder %s862_s19, %s2924_s5 }
  0xde   : >> { %873 = vst [vmem:[%s2166_s4 + $0x20] sm:$0xff] %v872_v50  ;;  %v878_v53 = vld [vmem:[%s2170_s28 + $0x78] sm:$0xff]  ;;  %875 = vst [vmem:[%s2166_s4 + $0x30] sm:$0xff] %v874_v51  ;;  %v880_v54 = vld [vmem:[%s2170_s28 + $0x90] sm:$0xff] }
  0xdf   : >> { %877 = vst [vmem:[%s2166_s4 + $0x40] sm:$0xff] %v876_v52  ;;  %879 = vst [vmem:[%s2166_s4 + $0x50] sm:$0xff] %v878_v53  ;;  %v882_v55 = vld [vmem:[%s2170_s28 + $0xa8] sm:$0xff]  ;;  %v884_v56 = vld [vmem:[%s2170_s28 + $0xc0] sm:$0xff]  ;;  %s3696_s1 = smov (%p965_p1, %s964_s1), 0 }
  0xe0   : >> { %881 = vst [vmem:[%s2166_s4 + $0x60] sm:$0xff] %v880_v54  ;;  %883 = vst [vmem:[%s2166_s4 + $0x70] sm:$0xff] %v882_v55  ;;  %v886_v57 = vld [vmem:[%s2170_s28 + $0xd8] sm:$0xff]  ;;  %v888_v58 = vld [vmem:[%s2170_s28 + $0xf0] sm:$0xff]  ;;  %s1659_s7 = sshll.u32 %s3696_s1, 3  ;;  %s3678_s30 = smov %s3696_s1 }
  0xe1   : >> { %885 = vst [vmem:[%s2166_s4 + $0x80] sm:$0xff] %v884_v56  ;;  %v890_v59 = vld [vmem:[%s2170_s28 + $0x108] sm:$0xff]  ;;  %887 = vst [vmem:[%s2166_s4 + $0x90] sm:$0xff] %v886_v57  ;;  %v892_v60 = vld [vmem:[%s2170_s28 + $0x120] sm:$0xff]  ;;  %s2998_s26 = scalar_lea.vmem %s2928_s20, %s1659_s7   ;;  %s3001_s21 = scalar_lea.vmem %s2931_s29, %s1659_s7 [#allocation2]  }
  0xe2   : >> { %889 = vst [vmem:[%s2166_s4 + $0xa0] sm:$0xff] %v888_v58  ;;  %891 = vst [vmem:[%s2166_s4 + $0xb0] sm:$0xff] %v890_v59  ;;  %v894_v61 = vld [vmem:[%s2170_s28 + $0x138] sm:$0xff]  ;;  %v896_v62 = vld [vmem:[%s2170_s28 + $0x150] sm:$0xff] }
  0xe3   : >> { %893 = vst [vmem:[%s2166_s4 + $0xc0] sm:$0xff] %v892_v60  ;;  %895 = vst [vmem:[%s2166_s4 + $0xd0] sm:$0xff] %v894_v61  ;;  %v898_v63 = vld [vmem:[%s2170_s28 + $0x168] sm:$0xff]  ;;  %v900_v0 = vld [vmem:[%s2170_s28 + $0x180] sm:$0xff] }
  0xe4   : >> { %897 = vst [vmem:[%s2166_s4 + $0xe0] sm:$0xff] %v896_v62  ;;  %v902_v1 = vld [vmem:[%s2170_s28 + $0x198] sm:$0xff]  ;;  %899 = vst [vmem:[%s2166_s4 + $0xf0] sm:$0xff] %v898_v63  ;;  %v904_v2 = vld [vmem:[%s2170_s28 + $0x1b0] sm:$0xff] }
  0xe5   : >> { %901 = vst [vmem:[%s2166_s4 + $0x100] sm:$0xff] %v900_v0  ;;  %903 = vst [vmem:[%s2166_s4 + $0x110] sm:$0xff] %v902_v1  ;;  %v906_v3 = vld [vmem:[%s2170_s28 + $0x1c8] sm:$0xff]  ;;  %v908_v4 = vld [vmem:[%s2170_s28 + $0x1e0] sm:$0xff] }
  0xe6   : >> { %905 = vst [vmem:[%s2166_s4 + $0x120] sm:$0xff] %v904_v2  ;;  %907 = vst [vmem:[%s2166_s4 + $0x130] sm:$0xff] %v906_v3  ;;  %v910_v5 = vld [vmem:[%s2170_s28 + $0x1f8] sm:$0xff]  ;;  %v912_v6 = vld [vmem:[%s2170_s28 + $0x210] sm:$0xff] }
  0xe7   : >> { %909 = vst [vmem:[%s2166_s4 + $0x140] sm:$0xff] %v908_v4  ;;  %v914_v7 = vld [vmem:[%s2170_s28 + $0x228] sm:$0xff]  ;;  %911 = vst [vmem:[%s2166_s4 + $0x150] sm:$0xff] %v910_v5  ;;  %v916_v8 = vld [vmem:[%s2170_s28 + $0x240] sm:$0xff] }
  0xe8   : >> { %913 = vst [vmem:[%s2166_s4 + $0x160] sm:$0xff] %v912_v6  ;;  %915 = vst [vmem:[%s2166_s4 + $0x170] sm:$0xff] %v914_v7  ;;  %v918_v9 = vld [vmem:[%s2170_s28 + $0x258] sm:$0xff]  ;;  %v920_v10 = vld [vmem:[%s2170_s28 + $0x270] sm:$0xff] }
  0xe9   : >> { %917 = vst [vmem:[%s2166_s4 + $0x180] sm:$0xff] %v916_v8  ;;  %919 = vst [vmem:[%s2166_s4 + $0x190] sm:$0xff] %v918_v9  ;;  %v922_v11 = vld [vmem:[%s2170_s28 + $0x288] sm:$0xff]  ;;  %v924_v12 = vld [vmem:[%s2170_s28 + $0x2a0] sm:$0xff] }
  0xea   : >> { %921 = vst [vmem:[%s2166_s4 + $0x1a0] sm:$0xff] %v920_v10  ;;  %v926_v13 = vld [vmem:[%s2170_s28 + $0x2b8] sm:$0xff]  ;;  %923 = vst [vmem:[%s2166_s4 + $0x1b0] sm:$0xff] %v922_v11  ;;  %v928_v14 = vld [vmem:[%s2170_s28 + $0x2d0] sm:$0xff] }
  0xeb   : >> { %925 = vst [vmem:[%s2166_s4 + $0x1c0] sm:$0xff] %v924_v12  ;;  %927 = vst [vmem:[%s2166_s4 + $0x1d0] sm:$0xff] %v926_v13  ;;  %v930_v15 = vld [vmem:[%s2170_s28 + $0x2e8] sm:$0xff]  ;;  %v932_v16 = vld [vmem:[%s2170_s28 + $0x300] sm:$0xff] }
  0xec   : >> { %929 = vst [vmem:[%s2166_s4 + $0x1e0] sm:$0xff] %v928_v14  ;;  %931 = vst [vmem:[%s2166_s4 + $0x1f0] sm:$0xff] %v930_v15  ;;  %v934_v17 = vld [vmem:[%s2170_s28 + $0x318] sm:$0xff]  ;;  %v936_v18 = vld [vmem:[%s2170_s28 + $0x330] sm:$0xff] }
  0xed   : >> { %933 = vst [vmem:[%s2166_s4 + $0x200] sm:$0xff] %v932_v16  ;;  %v938_v19 = vld [vmem:[%s2170_s28 + $0x348] sm:$0xff]  ;;  %935 = vst [vmem:[%s2166_s4 + $0x210] sm:$0xff] %v934_v17  ;;  %v940_v20 = vld [vmem:[%s2170_s28 + $0x360] sm:$0xff] }
  0xee   : >> { %937 = vst [vmem:[%s2166_s4 + $0x220] sm:$0xff] %v936_v18  ;;  %939 = vst [vmem:[%s2166_s4 + $0x230] sm:$0xff] %v938_v19  ;;  %v942_v21 = vld [vmem:[%s2170_s28 + $0x378] sm:$0xff]  ;;  %v944_v22 = vld [vmem:[%s2170_s28 + $0x390] sm:$0xff]  ;;  %864 = sbr.rel (!%p861_p2) target bundleno = 220 (0xdc), region = 195 }
  0xef   : >> { %941 = vst [vmem:[%s2166_s4 + $0x240] sm:$0xff] %v940_v20  ;;  %943 = vst [vmem:[%s2166_s4 + $0x250] sm:$0xff] %v942_v21  ;;  %v946_v23 = vld [vmem:[%s2170_s28 + $0x3a8] sm:$0xff]  ;;  %v948_v24 = vld [vmem:[%s2170_s28 + $0x3c0] sm:$0xff] }
  0xf0   : >> { %945 = vst [vmem:[%s2166_s4 + $0x260] sm:$0xff] %v944_v22  ;;  %v950_v25 = vld [vmem:[%s2170_s28 + $0x3d8] sm:$0xff]  ;;  %947 = vst [vmem:[%s2166_s4 + $0x270] sm:$0xff] %v946_v23  ;;  %v952_v26 = vld [vmem:[%s2170_s28 + $0x3f0] sm:$0xff] }
  0xf1   : >> { %949 = vst [vmem:[%s2166_s4 + $0x280] sm:$0xff] %v948_v24  ;;  %951 = vst [vmem:[%s2166_s4 + $0x290] sm:$0xff] %v950_v25  ;;  %v954_v27 = vld [vmem:[%s2170_s28 + $0x408] sm:$0xff]  ;;  %v956_v28 = vld [vmem:[%s2170_s28 + $0x420] sm:$0xff] }
  0xf2   : >> { %953 = vst [vmem:[%s2166_s4 + $0x2a0] sm:$0xff] %v952_v26  ;;  %955 = vst [vmem:[%s2166_s4 + $0x2b0] sm:$0xff] %v954_v27  ;;  %v958_v29 = vld [vmem:[%s2170_s28 + $0x438] sm:$0xff]  ;;  %v960_v30 = vld [vmem:[%s2170_s28 + $0x450] sm:$0xff] }
  0xf3   : >> { %957 = vst [vmem:[%s2166_s4 + $0x2c0] sm:$0xff] %v956_v28  ;;  %v962_v31 = vld [vmem:[%s2170_s28 + $0x468] sm:$0xff]  ;;  %959 = vst [vmem:[%s2166_s4 + $0x2d0] sm:$0xff] %v958_v29  ;;  %s3677_s28 = smov %s2998_s26 }
  0xf4   : >> { %961 = vst [vmem:[%s2166_s4 + $0x2e0] sm:$0xff] %v960_v30  ;;  %963 = vst [vmem:[%s2166_s4 + $0x2f0] sm:$0xff] %v962_v31  ;;  %s3676_s4 = smov %s3001_s21 }
  0xf5 PF: > { %s2180_s11 = smov 0  }
  0xf6   : > { %s3074_s23 = sshllo.u32 %s2180_s11, %s2275_s10 }
  0xf7   : > { %v980_v32 = vld [vmem:[%s2677_s18] sm:%s3074_s23]  ;;  %v982_v33 = vld [vmem:[%s2677_s18 + $0x18] sm:%s3074_s23] }
  0xf8   : > { %981 = vst [vmem:[%s2680_s27] sm:%s3074_s23] %v980_v32  ;;  %983 = vst [vmem:[%s2680_s27 + $0x10] sm:%s3074_s23] %v982_v33 }
  0xf9   : > { %v984_v34 = vld [vmem:[%s2677_s18 + $0x30] sm:%s3074_s23]  ;;  %v986_v35 = vld [vmem:[%s2677_s18 + $0x48] sm:%s3074_s23] }
  0xfa   : > { %985 = vst [vmem:[%s2680_s27 + $0x20] sm:%s3074_s23] %v984_v34  ;;  %987 = vst [vmem:[%s2680_s27 + $0x30] sm:%s3074_s23] %v986_v35 }
  0xfb   : > { %v988_v36 = vld [vmem:[%s2677_s18 + $0x60] sm:%s3074_s23]  ;;  %v990_v37 = vld [vmem:[%s2677_s18 + $0x78] sm:%s3074_s23] }
  0xfc   : > { %989 = vst [vmem:[%s2680_s27 + $0x40] sm:%s3074_s23] %v988_v36  ;;  %991 = vst [vmem:[%s2680_s27 + $0x50] sm:%s3074_s23] %v990_v37 }
  0xfd   : > { %v992_v38 = vld [vmem:[%s2677_s18 + $0x90] sm:%s3074_s23]  ;;  %v994_v39 = vld [vmem:[%s2677_s18 + $0xa8] sm:%s3074_s23] }
  0xfe   : > { %993 = vst [vmem:[%s2680_s27 + $0x60] sm:%s3074_s23] %v992_v38  ;;  %995 = vst [vmem:[%s2680_s27 + $0x70] sm:%s3074_s23] %v994_v39 }
  0xff   : > { %v996_v40 = vld [vmem:[%s2677_s18 + $0xc0] sm:%s3074_s23]  ;;  %v998_v41 = vld [vmem:[%s2677_s18 + $0xd8] sm:%s3074_s23] }
 0x100   : > { %997 = vst [vmem:[%s2680_s27 + $0x80] sm:%s3074_s23] %v996_v40  ;;  %999 = vst [vmem:[%s2680_s27 + $0x90] sm:%s3074_s23] %v998_v41 }
 0x101   : > { %v1000_v42 = vld [vmem:[%s2677_s18 + $0xf0] sm:%s3074_s23]  ;;  %v1002_v43 = vld [vmem:[%s2677_s18 + $0x108] sm:%s3074_s23] }
 0x102   : > { %1001 = vst [vmem:[%s2680_s27 + $0xa0] sm:%s3074_s23] %v1000_v42  ;;  %1003 = vst [vmem:[%s2680_s27 + $0xb0] sm:%s3074_s23] %v1002_v43 }
 0x103   : > { %v1004_v44 = vld [vmem:[%s2677_s18 + $0x120] sm:%s3074_s23]  ;;  %v1006_v45 = vld [vmem:[%s2677_s18 + $0x138] sm:%s3074_s23] }
 0x104   : > { %1005 = vst [vmem:[%s2680_s27 + $0xc0] sm:%s3074_s23] %v1004_v44  ;;  %1007 = vst [vmem:[%s2680_s27 + $0xd0] sm:%s3074_s23] %v1006_v45 }
 0x105   : > { %v1008_v46 = vld [vmem:[%s2677_s18 + $0x150] sm:%s3074_s23]  ;;  %v1010_v47 = vld [vmem:[%s2677_s18 + $0x168] sm:%s3074_s23] }
 0x106   : > { %1009 = vst [vmem:[%s2680_s27 + $0xe0] sm:%s3074_s23] %v1008_v46  ;;  %1011 = vst [vmem:[%s2680_s27 + $0xf0] sm:%s3074_s23] %v1010_v47 }
 0x107   : > { %v1012_v48 = vld [vmem:[%s2677_s18 + $0x180] sm:%s3074_s23]  ;;  %v1014_v49 = vld [vmem:[%s2677_s18 + $0x198] sm:%s3074_s23] }
 0x108   : > { %1013 = vst [vmem:[%s2680_s27 + $0x100] sm:%s3074_s23] %v1012_v48  ;;  %1015 = vst [vmem:[%s2680_s27 + $0x110] sm:%s3074_s23] %v1014_v49 }
 0x109   : > { %v1016_v50 = vld [vmem:[%s2677_s18 + $0x1b0] sm:%s3074_s23]  ;;  %v1018_v51 = vld [vmem:[%s2677_s18 + $0x1c8] sm:%s3074_s23] }
 0x10a   : > { %1017 = vst [vmem:[%s2680_s27 + $0x120] sm:%s3074_s23] %v1016_v50  ;;  %1019 = vst [vmem:[%s2680_s27 + $0x130] sm:%s3074_s23] %v1018_v51 }
 0x10b   : > { %v1020_v52 = vld [vmem:[%s2677_s18 + $0x1e0] sm:%s3074_s23]  ;;  %v1022_v53 = vld [vmem:[%s2677_s18 + $0x1f8] sm:%s3074_s23] }
 0x10c   : > { %1021 = vst [vmem:[%s2680_s27 + $0x140] sm:%s3074_s23] %v1020_v52  ;;  %1023 = vst [vmem:[%s2680_s27 + $0x150] sm:%s3074_s23] %v1022_v53 }
 0x10d   : > { %v1024_v54 = vld [vmem:[%s2677_s18 + $0x210] sm:%s3074_s23]  ;;  %v1026_v55 = vld [vmem:[%s2677_s18 + $0x228] sm:%s3074_s23] }
 0x10e   : > { %1025 = vst [vmem:[%s2680_s27 + $0x160] sm:%s3074_s23] %v1024_v54  ;;  %1027 = vst [vmem:[%s2680_s27 + $0x170] sm:%s3074_s23] %v1026_v55 }
 0x10f   : > { %v1028_v56 = vld [vmem:[%s2677_s18 + $0x240] sm:%s3074_s23]  ;;  %v1030_v57 = vld [vmem:[%s2677_s18 + $0x258] sm:%s3074_s23] }
 0x110   : > { %1029 = vst [vmem:[%s2680_s27 + $0x180] sm:%s3074_s23] %v1028_v56  ;;  %1031 = vst [vmem:[%s2680_s27 + $0x190] sm:%s3074_s23] %v1030_v57 }
 0x111   : > { %v1032_v58 = vld [vmem:[%s2677_s18 + $0x270] sm:%s3074_s23]  ;;  %v1034_v59 = vld [vmem:[%s2677_s18 + $0x288] sm:%s3074_s23] }
 0x112   : > { %1033 = vst [vmem:[%s2680_s27 + $0x1a0] sm:%s3074_s23] %v1032_v58  ;;  %1035 = vst [vmem:[%s2680_s27 + $0x1b0] sm:%s3074_s23] %v1034_v59 }
 0x113   : > { %v1036_v60 = vld [vmem:[%s2677_s18 + $0x2a0] sm:%s3074_s23]  ;;  %v1038_v61 = vld [vmem:[%s2677_s18 + $0x2b8] sm:%s3074_s23] }
 0x114   : > { %1037 = vst [vmem:[%s2680_s27 + $0x1c0] sm:%s3074_s23] %v1036_v60  ;;  %1039 = vst [vmem:[%s2680_s27 + $0x1d0] sm:%s3074_s23] %v1038_v61 }
 0x115   : > { %v1040_v62 = vld [vmem:[%s2677_s18 + $0x2d0] sm:%s3074_s23]  ;;  %v1042_v63 = vld [vmem:[%s2677_s18 + $0x2e8] sm:%s3074_s23] }
 0x116   : > { %1041 = vst [vmem:[%s2680_s27 + $0x1e0] sm:%s3074_s23] %v1040_v62  ;;  %1043 = vst [vmem:[%s2680_s27 + $0x1f0] sm:%s3074_s23] %v1042_v63 }
 0x117   : > { %v1044_v0 = vld [vmem:[%s2677_s18 + $0x300] sm:%s3074_s23]  ;;  %v1046_v1 = vld [vmem:[%s2677_s18 + $0x318] sm:%s3074_s23] }
 0x118   : > { %1045 = vst [vmem:[%s2680_s27 + $0x200] sm:%s3074_s23] %v1044_v0  ;;  %1047 = vst [vmem:[%s2680_s27 + $0x210] sm:%s3074_s23] %v1046_v1 }
 0x119   : > { %v1048_v2 = vld [vmem:[%s2677_s18 + $0x330] sm:%s3074_s23]  ;;  %v1050_v3 = vld [vmem:[%s2677_s18 + $0x348] sm:%s3074_s23] }
 0x11a   : > { %1049 = vst [vmem:[%s2680_s27 + $0x220] sm:%s3074_s23] %v1048_v2  ;;  %1051 = vst [vmem:[%s2680_s27 + $0x230] sm:%s3074_s23] %v1050_v3 }
 0x11b   : > { %v1052_v4 = vld [vmem:[%s2677_s18 + $0x360] sm:%s3074_s23]  ;;  %v1054_v5 = vld [vmem:[%s2677_s18 + $0x378] sm:%s3074_s23] }
 0x11c   : > { %1053 = vst [vmem:[%s2680_s27 + $0x240] sm:%s3074_s23] %v1052_v4  ;;  %1055 = vst [vmem:[%s2680_s27 + $0x250] sm:%s3074_s23] %v1054_v5 }
 0x11d   : > { %v1056_v6 = vld [vmem:[%s2677_s18 + $0x390] sm:%s3074_s23]  ;;  %v1058_v7 = vld [vmem:[%s2677_s18 + $0x3a8] sm:%s3074_s23] }
 0x11e   : > { %1057 = vst [vmem:[%s2680_s27 + $0x260] sm:%s3074_s23] %v1056_v6  ;;  %1059 = vst [vmem:[%s2680_s27 + $0x270] sm:%s3074_s23] %v1058_v7 }
 0x11f   : > { %v1060_v8 = vld [vmem:[%s2677_s18 + $0x3c0] sm:%s3074_s23]  ;;  %v1062_v9 = vld [vmem:[%s2677_s18 + $0x3d8] sm:%s3074_s23] }
 0x120   : > { %1061 = vst [vmem:[%s2680_s27 + $0x280] sm:%s3074_s23] %v1060_v8  ;;  %1063 = vst [vmem:[%s2680_s27 + $0x290] sm:%s3074_s23] %v1062_v9 }
 0x121   : > { %v1064_v10 = vld [vmem:[%s2677_s18 + $0x3f0] sm:%s3074_s23]  ;;  %v1066_v11 = vld [vmem:[%s2677_s18 + $0x408] sm:%s3074_s23] }
 0x122   : > { %1065 = vst [vmem:[%s2680_s27 + $0x2a0] sm:%s3074_s23] %v1064_v10  ;;  %1067 = vst [vmem:[%s2680_s27 + $0x2b0] sm:%s3074_s23] %v1066_v11 }
 0x123   : > { %v1068_v12 = vld [vmem:[%s2677_s18 + $0x420] sm:%s3074_s23]  ;;  %v1070_v13 = vld [vmem:[%s2677_s18 + $0x438] sm:%s3074_s23] }
 0x124   : > { %1069 = vst [vmem:[%s2680_s27 + $0x2c0] sm:%s3074_s23] %v1068_v12  ;;  %1071 = vst [vmem:[%s2680_s27 + $0x2d0] sm:%s3074_s23] %v1070_v13 }
 0x125   : > { %v1072_v14 = vld [vmem:[%s2677_s18 + $0x450] sm:%s3074_s23]  ;;  %v1074_v15 = vld [vmem:[%s2677_s18 + $0x468] sm:%s3074_s23] }
 0x126   : > { %1073 = vst [vmem:[%s2680_s27 + $0x2e0] sm:%s3074_s23] %v1072_v14  ;;  %1075 = vst [vmem:[%s2680_s27 + $0x2f0] sm:%s3074_s23] %v1074_v15 }
 0x127 PF: > { %p1661_p3 = scmp.ge.u32.totalorder %s2269_s8, 8 }
 0x128   : > { %s2181_s20 = smov (!%p1661_p3), 0  }
 0x129   : > { %182 = sbr.rel (%p1661_p3) target bundleno = 346 (0x15a), region = 36  ;;  %s3270_s10 = sshllo.u32 (!%p1661_p3), %s2181_s20, %s2269_s8 }
 0x12a   : > { %v192_v16 = vld [vmem:[%s2267_s6] sm:%s3270_s10] (!%p1661_p3)  ;;  %v194_v17 = vld [vmem:[%s2267_s6 + $0x18] sm:%s3270_s10] (!%p1661_p3) }
 0x12b   : > { %193 = vst [vmem:[%s2271_s9] sm:%s3270_s10] (!%p1661_p3), %v192_v16  ;;  %195 = vst [vmem:[%s2271_s9 + $0x10] sm:%s3270_s10] (!%p1661_p3), %v194_v17 }
 0x12c   : > { %v196_v18 = vld [vmem:[%s2267_s6 + $0x30] sm:%s3270_s10] (!%p1661_p3)  ;;  %v198_v19 = vld [vmem:[%s2267_s6 + $0x48] sm:%s3270_s10] (!%p1661_p3) }
 0x12d   : > { %197 = vst [vmem:[%s2271_s9 + $0x20] sm:%s3270_s10] (!%p1661_p3), %v196_v18  ;;  %199 = vst [vmem:[%s2271_s9 + $0x30] sm:%s3270_s10] (!%p1661_p3), %v198_v19 }
 0x12e   : > { %v200_v20 = vld [vmem:[%s2267_s6 + $0x60] sm:%s3270_s10] (!%p1661_p3)  ;;  %v202_v21 = vld [vmem:[%s2267_s6 + $0x78] sm:%s3270_s10] (!%p1661_p3) }
 0x12f   : > { %201 = vst [vmem:[%s2271_s9 + $0x40] sm:%s3270_s10] (!%p1661_p3), %v200_v20  ;;  %203 = vst [vmem:[%s2271_s9 + $0x50] sm:%s3270_s10] (!%p1661_p3), %v202_v21 }
 0x130   : > { %v204_v22 = vld [vmem:[%s2267_s6 + $0x90] sm:%s3270_s10]  ;;  %v206_v23 = vld [vmem:[%s2267_s6 + $0xa8] sm:%s3270_s10] }
 0x131   : > { %205 = vst [vmem:[%s2271_s9 + $0x60] sm:%s3270_s10] %v204_v22  ;;  %207 = vst [vmem:[%s2271_s9 + $0x70] sm:%s3270_s10] %v206_v23 }
 0x132   : > { %v208_v24 = vld [vmem:[%s2267_s6 + $0xc0] sm:%s3270_s10]  ;;  %v210_v25 = vld [vmem:[%s2267_s6 + $0xd8] sm:%s3270_s10] }
 0x133   : > { %209 = vst [vmem:[%s2271_s9 + $0x80] sm:%s3270_s10] %v208_v24  ;;  %211 = vst [vmem:[%s2271_s9 + $0x90] sm:%s3270_s10] %v210_v25 }
 0x134   : > { %v212_v26 = vld [vmem:[%s2267_s6 + $0xf0] sm:%s3270_s10]  ;;  %v214_v27 = vld [vmem:[%s2267_s6 + $0x108] sm:%s3270_s10] }
 0x135   : > { %213 = vst [vmem:[%s2271_s9 + $0xa0] sm:%s3270_s10] %v212_v26  ;;  %215 = vst [vmem:[%s2271_s9 + $0xb0] sm:%s3270_s10] %v214_v27 }
 0x136   : > { %v216_v28 = vld [vmem:[%s2267_s6 + $0x120] sm:%s3270_s10]  ;;  %v218_v29 = vld [vmem:[%s2267_s6 + $0x138] sm:%s3270_s10] }
 0x137   : > { %217 = vst [vmem:[%s2271_s9 + $0xc0] sm:%s3270_s10] %v216_v28  ;;  %219 = vst [vmem:[%s2271_s9 + $0xd0] sm:%s3270_s10] %v218_v29 }
 0x138   : > { %v220_v30 = vld [vmem:[%s2267_s6 + $0x150] sm:%s3270_s10]  ;;  %v222_v31 = vld [vmem:[%s2267_s6 + $0x168] sm:%s3270_s10] }
 0x139   : > { %221 = vst [vmem:[%s2271_s9 + $0xe0] sm:%s3270_s10] %v220_v30  ;;  %223 = vst [vmem:[%s2271_s9 + $0xf0] sm:%s3270_s10] %v222_v31 }
 0x13a   : > { %v224_v32 = vld [vmem:[%s2267_s6 + $0x180] sm:%s3270_s10]  ;;  %v226_v33 = vld [vmem:[%s2267_s6 + $0x198] sm:%s3270_s10] }
 0x13b   : > { %225 = vst [vmem:[%s2271_s9 + $0x100] sm:%s3270_s10] %v224_v32  ;;  %227 = vst [vmem:[%s2271_s9 + $0x110] sm:%s3270_s10] %v226_v33 }
 0x13c   : > { %v228_v34 = vld [vmem:[%s2267_s6 + $0x1b0] sm:%s3270_s10]  ;;  %v230_v35 = vld [vmem:[%s2267_s6 + $0x1c8] sm:%s3270_s10] }
 0x13d   : > { %229 = vst [vmem:[%s2271_s9 + $0x120] sm:%s3270_s10] %v228_v34  ;;  %231 = vst [vmem:[%s2271_s9 + $0x130] sm:%s3270_s10] %v230_v35 }
 0x13e   : > { %v232_v36 = vld [vmem:[%s2267_s6 + $0x1e0] sm:%s3270_s10]  ;;  %v234_v37 = vld [vmem:[%s2267_s6 + $0x1f8] sm:%s3270_s10] }
 0x13f   : > { %233 = vst [vmem:[%s2271_s9 + $0x140] sm:%s3270_s10] %v232_v36  ;;  %235 = vst [vmem:[%s2271_s9 + $0x150] sm:%s3270_s10] %v234_v37 }
 0x140   : > { %v236_v38 = vld [vmem:[%s2267_s6 + $0x210] sm:%s3270_s10]  ;;  %v238_v39 = vld [vmem:[%s2267_s6 + $0x228] sm:%s3270_s10] }
 0x141   : > { %237 = vst [vmem:[%s2271_s9 + $0x160] sm:%s3270_s10] %v236_v38  ;;  %239 = vst [vmem:[%s2271_s9 + $0x170] sm:%s3270_s10] %v238_v39 }
 0x142   : > { %v240_v40 = vld [vmem:[%s2267_s6 + $0x240] sm:%s3270_s10]  ;;  %v242_v41 = vld [vmem:[%s2267_s6 + $0x258] sm:%s3270_s10] }
 0x143   : > { %241 = vst [vmem:[%s2271_s9 + $0x180] sm:%s3270_s10] %v240_v40  ;;  %243 = vst [vmem:[%s2271_s9 + $0x190] sm:%s3270_s10] %v242_v41 }
 0x144   : > { %v244_v42 = vld [vmem:[%s2267_s6 + $0x270] sm:%s3270_s10]  ;;  %v246_v43 = vld [vmem:[%s2267_s6 + $0x288] sm:%s3270_s10] }
 0x145   : > { %245 = vst [vmem:[%s2271_s9 + $0x1a0] sm:%s3270_s10] %v244_v42  ;;  %247 = vst [vmem:[%s2271_s9 + $0x1b0] sm:%s3270_s10] %v246_v43 }
 0x146   : > { %v248_v44 = vld [vmem:[%s2267_s6 + $0x2a0] sm:%s3270_s10]  ;;  %v250_v45 = vld [vmem:[%s2267_s6 + $0x2b8] sm:%s3270_s10] }
 0x147   : > { %249 = vst [vmem:[%s2271_s9 + $0x1c0] sm:%s3270_s10] %v248_v44  ;;  %251 = vst [vmem:[%s2271_s9 + $0x1d0] sm:%s3270_s10] %v250_v45 }
 0x148   : > { %v252_v46 = vld [vmem:[%s2267_s6 + $0x2d0] sm:%s3270_s10]  ;;  %v254_v47 = vld [vmem:[%s2267_s6 + $0x2e8] sm:%s3270_s10] }
 0x149   : > { %253 = vst [vmem:[%s2271_s9 + $0x1e0] sm:%s3270_s10] %v252_v46  ;;  %255 = vst [vmem:[%s2271_s9 + $0x1f0] sm:%s3270_s10] %v254_v47 }
 0x14a   : > { %v256_v48 = vld [vmem:[%s2267_s6 + $0x300] sm:%s3270_s10]  ;;  %v258_v49 = vld [vmem:[%s2267_s6 + $0x318] sm:%s3270_s10] }
 0x14b   : > { %257 = vst [vmem:[%s2271_s9 + $0x200] sm:%s3270_s10] %v256_v48  ;;  %259 = vst [vmem:[%s2271_s9 + $0x210] sm:%s3270_s10] %v258_v49 }
 0x14c   : > { %v260_v50 = vld [vmem:[%s2267_s6 + $0x330] sm:%s3270_s10]  ;;  %v262_v51 = vld [vmem:[%s2267_s6 + $0x348] sm:%s3270_s10] }
 0x14d   : > { %261 = vst [vmem:[%s2271_s9 + $0x220] sm:%s3270_s10] %v260_v50  ;;  %263 = vst [vmem:[%s2271_s9 + $0x230] sm:%s3270_s10] %v262_v51 }
 0x14e   : > { %v264_v52 = vld [vmem:[%s2267_s6 + $0x360] sm:%s3270_s10]  ;;  %v266_v53 = vld [vmem:[%s2267_s6 + $0x378] sm:%s3270_s10] }
 0x14f   : > { %265 = vst [vmem:[%s2271_s9 + $0x240] sm:%s3270_s10] %v264_v52  ;;  %267 = vst [vmem:[%s2271_s9 + $0x250] sm:%s3270_s10] %v266_v53 }
 0x150   : > { %v268_v54 = vld [vmem:[%s2267_s6 + $0x390] sm:%s3270_s10]  ;;  %v270_v55 = vld [vmem:[%s2267_s6 + $0x3a8] sm:%s3270_s10] }
 0x151   : > { %269 = vst [vmem:[%s2271_s9 + $0x260] sm:%s3270_s10] %v268_v54  ;;  %271 = vst [vmem:[%s2271_s9 + $0x270] sm:%s3270_s10] %v270_v55 }
 0x152   : > { %v272_v56 = vld [vmem:[%s2267_s6 + $0x3c0] sm:%s3270_s10]  ;;  %v274_v57 = vld [vmem:[%s2267_s6 + $0x3d8] sm:%s3270_s10] }
 0x153   : > { %273 = vst [vmem:[%s2271_s9 + $0x280] sm:%s3270_s10] %v272_v56  ;;  %275 = vst [vmem:[%s2271_s9 + $0x290] sm:%s3270_s10] %v274_v57 }
 0x154   : > { %v276_v58 = vld [vmem:[%s2267_s6 + $0x3f0] sm:%s3270_s10]  ;;  %v278_v59 = vld [vmem:[%s2267_s6 + $0x408] sm:%s3270_s10] }
 0x155   : > { %277 = vst [vmem:[%s2271_s9 + $0x2a0] sm:%s3270_s10] %v276_v58  ;;  %279 = vst [vmem:[%s2271_s9 + $0x2b0] sm:%s3270_s10] %v278_v59 }
 0x156   : > { %v280_v60 = vld [vmem:[%s2267_s6 + $0x420] sm:%s3270_s10]  ;;  %v282_v61 = vld [vmem:[%s2267_s6 + $0x438] sm:%s3270_s10] }
 0x157   : > { %281 = vst [vmem:[%s2271_s9 + $0x2c0] sm:%s3270_s10] %v280_v60  ;;  %283 = vst [vmem:[%s2271_s9 + $0x2d0] sm:%s3270_s10] %v282_v61 }
 0x158   : > { %v284_v62 = vld [vmem:[%s2267_s6 + $0x450] sm:%s3270_s10]  ;;  %v286_v63 = vld [vmem:[%s2267_s6 + $0x468] sm:%s3270_s10] }
 0x159   : > { %285 = vst [vmem:[%s2271_s9 + $0x2e0] sm:%s3270_s10] %v284_v62  ;;  %287 = vst [vmem:[%s2271_s9 + $0x2f0] sm:%s3270_s10] %v286_v63 }
 0x15a PF: > { %p1662_p4 = scmp.ge.s32.totalorder %s2114_s17, 1  ;;  %p1094_p6 = scmp.lt.s32.totalorder %s2114_s17, 3 }
 0x15c   : > { %p1095_p7 = pnand %p1662_p4, %p1094_p6 }
 0x15d   : > { %s3467_s8 = sand.u32 (!%p1095_p7), 1, %s2098_s13   ;;  %v3472_v0 = vld [vmem:[%s3649_s0] sm:$0x77] (!%p1095_p7)  ;;  %v2182_v2 = vmov (!%p1095_p7), 0.0   ;;  %s3580_s4 = sshll.u32 (!%p1095_p7), %s2106_s15, 1 }
 0x15e   : > { %1098 = sbr.rel (%p1095_p7) target bundleno = 679 (0x2a7), region = 94  ;;  %v1276_v1 = vcombine.high (!%p1095_p7), %v3472_v0, %v3472_v0  ;;  %1413 = vmatprep.mubr.f32.mxu0 (!%p1095_p7), %v2182_v2  ;;  %p1152_p8 = scmp.lt.s32.totalorder (!%p1095_p7), %s3580_s4, 2 }
 0x15f   : > { %s1781_s6 = smul.u32 (!%p1095_p7), 768, %s3467_s8  ;;  %s1663_s7 = sshll.u32 (!%p1095_p7), %s3467_s8, 3 }
 0x160   : > { %1342 = vmatprep.mubr.f32.mxu1 (!%p1095_p7), %v1276_v1  ;;  %s1136_s26 = scalar_lea.vmem (!%p1095_p7), [#allocation3], %s1663_s7  ;;  %s1428_s21 = scalar_lea.sflag (!%p1095_p7), [#allocation4], %s3467_s8 }
 0x161   : > { %s3477_s9 = scalar_lea.vmem (!%p1095_p7), [#allocation2], %s1781_s6 }
 0x162   : > { %v1168_v3 = vld [vmem:[%s3477_s9 + $0x8] sm:$0xff] (!%p1095_p7)  ;;  %v1170_v4 = vld [vmem:[%s3477_s9 + $0x18] sm:$0xff] (!%p1095_p7)  ;;  %v1167_v5 = vld [vmem:[%s3477_s9] sm:$0xff] (!%p1095_p7) }
 0x163   : > { %v1680_v6 = vpack.c.bf16 (!%p1095_p7), %v1170_v4, %v1168_v3  ;;  %v1169_v7 = vld [vmem:[%s3477_s9 + $0x10] sm:$0xff] (!%p1095_p7)  ;;  %v1172_v8 = vld [vmem:[%s3477_s9 + $0x28] sm:$0xff] (!%p1095_p7)  ;;  %v1174_v9 = vld [vmem:[%s3477_s9 + $0x38] sm:$0xff] (!%p1095_p7) }
 0x164   : > { %v1682_v10 = vpack.c.bf16 (!%p1095_p7), %v1169_v7, %v1167_v5  ;;  %v1684_v11 = vpack.c.bf16 (!%p1095_p7), %v1174_v9, %v1172_v8  ;;  %v1171_v12 = vld [vmem:[%s3477_s9 + $0x20] sm:$0xff] (!%p1095_p7)  ;;  %v1173_v13 = vld [vmem:[%s3477_s9 + $0x30] sm:$0xff] (!%p1095_p7)  ;;  %v1176_v14 = vld [vmem:[%s3477_s9 + $0x48] sm:$0xff] (!%p1095_p7) }
 0x165   : > { %1681 = vmatprep.subr.bf16.mxu1 %v1680_v6  ;;  %v1178_v15 = vld [vmem:[%s3477_s9 + $0x58] sm:$0xff]  ;;  %v1686_v16 = vpack.c.bf16 %v1173_v13, %v1171_v12  ;;  %v1175_v18 = vld [vmem:[%s3477_s9 + $0x40] sm:$0xff]  ;;  %v1177_v19 = vld [vmem:[%s3477_s9 + $0x50] sm:$0xff]  ;;  %s1153_s28 = scalar_select %p1152_p8, %s3580_s4, 2 }
 0x166   : > { %1683 = vmatpush1.bf16.msra.mxu1 %v1682_v10  ;;  %v1688_v17 = vpack.c.bf16 %v1178_v15, %v1176_v14  ;;  %v1180_v20 = vld [vmem:[%s3477_s9 + $0x68] sm:$0xff]  ;;  %v1182_v21 = vld [vmem:[%s3477_s9 + $0x78] sm:$0xff]  ;;  %v1690_v22 = vpack.c.bf16 %v1177_v19, %v1175_v18  ;;  %v1179_v24 = vld [vmem:[%s3477_s9 + $0x60] sm:$0xff]  ;;  %s1436_s11 = ssub.s32 (%p2243_p5), 3, %s3580_s4 }
 0x167   : > { %1685 = vmatprep.subr.bf16.mxu1 %v1684_v11  ;;  %v1692_v23 = vpack.c.bf16 %v1182_v21, %v1180_v20  ;;  %v1181_v25 = vld [vmem:[%s3477_s9 + $0x70] sm:$0xff]  ;;  %v1184_v26 = vld [vmem:[%s3477_s9 + $0x88] sm:$0xff]  ;;  %v1186_v27 = vld [vmem:[%s3477_s9 + $0x98] sm:$0xff]  ;;  %s1154_s1 = scalar_lea.vmem %s3651_s2, %s1153_s28  ;;  %p1437_p11 = scmp.lt.s32.totalorder (%p2243_p5), %s1436_s11, 2 }
 0x168   : > { %v1694_v28 = vpack.c.bf16 %v1181_v25, %v1179_v24  ;;  %v1232_v29 = vld [vmem:[%s3477_s9 + $0x208] sm:$0xff]  ;;  %v1234_v30 = vld [vmem:[%s3477_s9 + $0x218] sm:$0xff]  ;;  %v1231_v31 = vld [vmem:[%s3477_s9 + $0x200] sm:$0xff]  ;;  %v1696_v32 = vpack.c.bf16 %v1186_v27, %v1184_v26 }
 0x169   : > { %v1183_v33 = vld [vmem:[%s3477_s9 + $0x80] sm:$0xff]  ;;  %v1185_v34 = vld [vmem:[%s3477_s9 + $0x90] sm:$0xff]  ;;  %v1744_v35 = vpack.c.bf16 %v1234_v30, %v1232_v29  ;;  %v1188_v37 = vld [vmem:[%s3477_s9 + $0xa8] sm:$0xff] }
 0x16a   : > { %1687 = vmatpush1.bf16.msra.mxu1 %v1686_v16  ;;  %v1233_v36 = vld [vmem:[%s3477_s9 + $0x210] sm:$0xff]  ;;  %v1190_v38 = vld [vmem:[%s3477_s9 + $0xb8] sm:$0xff]  ;;  %v1236_v40 = vld [vmem:[%s3477_s9 + $0x228] sm:$0xff]  ;;  %v1698_v44 = vpack.c.bf16 %v1185_v34, %v1183_v33 }
 0x16b   : > { %1689 = vmatprep.subr.bf16.mxu1 %v1688_v17  ;;  %v1746_v39 = vpack.c.bf16 %v1233_v36, %v1231_v31  ;;  %1745 = vmatprep.subr.bf16.mxu0 %v1744_v35  ;;  %v1238_v41 = vld [vmem:[%s3477_s9 + $0x238] sm:$0xff]  ;;  %v1235_v42 = vld [vmem:[%s3477_s9 + $0x220] sm:$0xff]  ;;  %v1237_v43 = vld [vmem:[%s3477_s9 + $0x230] sm:$0xff]  ;;  %v1700_v49 = vpack.c.bf16 %v1190_v38, %v1188_v37 }
 0x16c   : > { %v1187_v45 = vld [vmem:[%s3477_s9 + $0xa0] sm:$0xff]  ;;  %v1189_v46 = vld [vmem:[%s3477_s9 + $0xb0] sm:$0xff]  ;;  %v1748_v47 = vpack.c.bf16 %v1238_v41, %v1236_v40  ;;  %v1750_v48 = vpack.c.bf16 %v1237_v43, %v1235_v42  ;;  %v1192_v50 = vld [vmem:[%s3477_s9 + $0xc8] sm:$0xff] }
 0x16d   : > { %1747 = vmatpush1.bf16.msra.mxu0 %v1746_v39  ;;  %v1240_v51 = vld [vmem:[%s3477_s9 + $0x248] sm:$0xff]  ;;  %v1242_v52 = vld [vmem:[%s3477_s9 + $0x258] sm:$0xff]  ;;  %v1239_v55 = vld [vmem:[%s3477_s9 + $0x240] sm:$0xff]  ;;  %v1702_v57 = vpack.c.bf16 %v1189_v46, %v1187_v45 }
 0x16e   : > { %1691 = vmatpush1.bf16.msra.mxu1 %v1690_v22  ;;  %v1194_v53 = vld [vmem:[%s3477_s9 + $0xd8] sm:$0xff]  ;;  %1749 = vmatprep.subr.bf16.mxu0 %v1748_v47  ;;  %v1752_v54 = vpack.c.bf16 %v1242_v52, %v1240_v51  ;;  %v1241_v56 = vld [vmem:[%s3477_s9 + $0x250] sm:$0xff]  ;;  %v1191_v58 = vld [vmem:[%s3477_s9 + $0xc0] sm:$0xff] }
 0x16f   : > { %1693 = vmatprep.subr.bf16.mxu1 %v1692_v23  ;;  %v1754_v59 = vpack.c.bf16 %v1241_v56, %v1239_v55  ;;  %v1244_v60 = vld [vmem:[%s3477_s9 + $0x268] sm:$0xff]  ;;  %v1246_v61 = vld [vmem:[%s3477_s9 + $0x278] sm:$0xff]  ;;  %v1704_v62 = vpack.c.bf16 %v1194_v53, %v1192_v50  ;;  %v1193_v63 = vld [vmem:[%s3477_s9 + $0xd0] sm:$0xff] }
 0x170   : > { %v1756_v1 = vpack.c.bf16 %v1246_v61, %v1244_v60  ;;  %v1243_v2 = vld [vmem:[%s3477_s9 + $0x260] sm:$0xff]  ;;  %v1245_v3 = vld [vmem:[%s3477_s9 + $0x270] sm:$0xff]  ;;  %v1196_v4 = vld [vmem:[%s3477_s9 + $0xe8] sm:$0xff]  ;;  %v1706_v8 = vpack.c.bf16 %v1193_v63, %v1191_v58 }
 0x171   : > { %1751 = vmatpush1.bf16.msra.mxu0 %v1750_v48  ;;  %v1198_v5 = vld [vmem:[%s3477_s9 + $0xf8] sm:$0xff]  ;;  %v1248_v6 = vld [vmem:[%s3477_s9 + $0x288] sm:$0xff]  ;;  %v1195_v9 = vld [vmem:[%s3477_s9 + $0xe0] sm:$0xff]  ;;  %v1758_v11 = vpack.c.bf16 %v1245_v3, %v1243_v2 }
 0x172   : > { %1695 = vmatpush1.bf16.msra.mxu1 %v1694_v28  ;;  %1753 = vmatprep.subr.bf16.mxu0 %v1752_v54  ;;  %v1250_v7 = vld [vmem:[%s3477_s9 + $0x298] sm:$0xff]  ;;  %v1197_v10 = vld [vmem:[%s3477_s9 + $0xf0] sm:$0xff]  ;;  %v1708_v12 = vpack.c.bf16 %v1198_v5, %v1196_v4  ;;  %v1200_v13 = vld [vmem:[%s3477_s9 + $0x108] sm:$0xff] }
 0x173   : > { %1697 = vmatprep.subr.bf16.mxu1 %v1696_v32  ;;  %v1760_v14 = vpack.c.bf16 %v1250_v7, %v1248_v6  ;;  %v1247_v15 = vld [vmem:[%s3477_s9 + $0x280] sm:$0xff]  ;;  %v1249_v16 = vld [vmem:[%s3477_s9 + $0x290] sm:$0xff]  ;;  %v1202_v17 = vld [vmem:[%s3477_s9 + $0x118] sm:$0xff]  ;;  %v1710_v20 = vpack.c.bf16 %v1197_v10, %v1195_v9 }
 0x174   : > { %v1252_v18 = vld [vmem:[%s3477_s9 + $0x2a8] sm:$0xff]  ;;  %v1254_v19 = vld [vmem:[%s3477_s9 + $0x2b8] sm:$0xff]  ;;  %v1199_v21 = vld [vmem:[%s3477_s9 + $0x100] sm:$0xff]  ;;  %v1762_v23 = vpack.c.bf16 %v1249_v16, %v1247_v15  ;;  %v1712_v24 = vpack.c.bf16 %v1202_v17, %v1200_v13 }
 0x175   : > { %1755 = vmatpush1.bf16.msra.mxu0 %v1754_v59  ;;  %v1201_v22 = vld [vmem:[%s3477_s9 + $0x110] sm:$0xff]  ;;  %v1204_v25 = vld [vmem:[%s3477_s9 + $0x128] sm:$0xff]  ;;  %v1764_v26 = vpack.c.bf16 %v1254_v19, %v1252_v18  ;;  %v1251_v27 = vld [vmem:[%s3477_s9 + $0x2a0] sm:$0xff] }
 0x176   : > { %1699 = vmatpush1.bf16.msra.mxu1 %v1698_v44  ;;  %1757 = vmatprep.subr.bf16.mxu0 %v1756_v1  ;;  %v1253_v28 = vld [vmem:[%s3477_s9 + $0x2b0] sm:$0xff]  ;;  %v1206_v29 = vld [vmem:[%s3477_s9 + $0x138] sm:$0xff]  ;;  %v1256_v30 = vld [vmem:[%s3477_s9 + $0x2c8] sm:$0xff]  ;;  %v1714_v32 = vpack.c.bf16 %v1201_v22, %v1199_v21 }
 0x177   : > { %1701 = vmatprep.subr.bf16.mxu1 %v1700_v49  ;;  %v1258_v31 = vld [vmem:[%s3477_s9 + $0x2d8] sm:$0xff]  ;;  %v1203_v33 = vld [vmem:[%s3477_s9 + $0x120] sm:$0xff]  ;;  %v1205_v34 = vld [vmem:[%s3477_s9 + $0x130] sm:$0xff]  ;;  %v1766_v35 = vpack.c.bf16 %v1253_v28, %v1251_v27  ;;  %v1716_v36 = vpack.c.bf16 %v1206_v29, %v1204_v25 }
 0x178   : > { %v1208_v37 = vld [vmem:[%s3477_s9 + $0x148] sm:$0xff]  ;;  %v1768_v38 = vpack.c.bf16 %v1258_v31, %v1256_v30  ;;  %v1255_v39 = vld [vmem:[%s3477_s9 + $0x2c0] sm:$0xff]  ;;  %v1257_v40 = vld [vmem:[%s3477_s9 + $0x2d0] sm:$0xff]  ;;  %v1718_v44 = vpack.c.bf16 %v1205_v34, %v1203_v33 }
 0x179   : > { %1759 = vmatpush1.bf16.msra.mxu0 %v1758_v11  ;;  %v1210_v41 = vld [vmem:[%s3477_s9 + $0x158] sm:$0xff]  ;;  %v1260_v42 = vld [vmem:[%s3477_s9 + $0x2e8] sm:$0xff]  ;;  %v1207_v45 = vld [vmem:[%s3477_s9 + $0x140] sm:$0xff]  ;;  %v1770_v46 = vpack.c.bf16 %v1257_v40, %v1255_v39 }
 0x17a   : > { %1703 = vmatpush1.bf16.msra.mxu1 %v1702_v57  ;;  %1761 = vmatprep.subr.bf16.mxu0 %v1760_v14  ;;  %v1262_v43 = vld [vmem:[%s3477_s9 + $0x2f8] sm:$0xff]  ;;  %v1720_v47 = vpack.c.bf16 %v1210_v41, %v1208_v37  ;;  %v1209_v48 = vld [vmem:[%s3477_s9 + $0x150] sm:$0xff]  ;;  %v1259_v50 = vld [vmem:[%s3477_s9 + $0x2e0] sm:$0xff] }
 0x17b   : > { %1705 = vmatprep.subr.bf16.mxu1 %v1704_v62  ;;  %v1772_v49 = vpack.c.bf16 %v1262_v43, %v1260_v42  ;;  %v1261_v51 = vld [vmem:[%s3477_s9 + $0x2f0] sm:$0xff]  ;;  %v1212_v52 = vld [vmem:[%s3477_s9 + $0x168] sm:$0xff]  ;;  %v1214_v53 = vld [vmem:[%s3477_s9 + $0x178] sm:$0xff]  ;;  %v1722_v54 = vpack.c.bf16 %v1209_v48, %v1207_v45 }
 0x17c   : > { %v1774_v55 = vpack.c.bf16 %v1261_v51, %v1259_v50  ;;  %v1724_v56 = vpack.c.bf16 %v1214_v53, %v1212_v52  ;;  %v1211_v57 = vld [vmem:[%s3477_s9 + $0x160] sm:$0xff]  ;;  %v1213_v58 = vld [vmem:[%s3477_s9 + $0x170] sm:$0xff]  ;;  %v1216_v59 = vld [vmem:[%s3477_s9 + $0x188] sm:$0xff] }
 0x17d   : > { %1763 = vmatpush1.bf16.msra.mxu0 %v1762_v23  ;;  %v1218_v60 = vld [vmem:[%s3477_s9 + $0x198] sm:$0xff]  ;;  %v1726_v61 = vpack.c.bf16 %v1213_v58, %v1211_v57  ;;  %v1166_v62 = vld [vmem:[%s3649_s0 + $0x8] sm:$0x7]  ;;  %v1215_v1 = vld [vmem:[%s3477_s9 + $0x180] sm:$0xff] }
 0x17e   : > { %1707 = vmatpush1.bf16.msra.mxu1 %v1706_v8  ;;  %1765 = vmatprep.subr.bf16.mxu0 %v1764_v26  ;;  %v1728_v63 = vpack.c.bf16 %v1218_v60, %v1216_v59  ;;  %v1217_v2 = vld [vmem:[%s3477_s9 + $0x190] sm:$0xff]  ;;  %v1220_v3 = vld [vmem:[%s3477_s9 + $0x1a8] sm:$0xff]  ;;  %v1222_v4 = vld [vmem:[%s3477_s9 + $0x1b8] sm:$0xff] }
 0x17f   : > { %1709 = vmatprep.subr.bf16.mxu1 %v1708_v12  ;;  %v1730_v5 = vpack.c.bf16 %v1217_v2, %v1215_v1  ;;  %v1732_v6 = vpack.c.bf16 %v1222_v4, %v1220_v3  ;;  %v1219_v7 = vld [vmem:[%s3477_s9 + $0x1a0] sm:$0xff]  ;;  %v1221_v8 = vld [vmem:[%s3477_s9 + $0x1b0] sm:$0xff]  ;;  %v1224_v9 = vld [vmem:[%s3477_s9 + $0x1c8] sm:$0xff] }
 0x180   : > { %v1226_v10 = vld [vmem:[%s3477_s9 + $0x1d8] sm:$0xff]  ;;  %v1734_v11 = vpack.c.bf16 %v1221_v8, %v1219_v7  ;;  %v1223_v13 = vld [vmem:[%s3477_s9 + $0x1c0] sm:$0xff]  ;;  %v1225_v14 = vld [vmem:[%s3477_s9 + $0x1d0] sm:$0xff] }
 0x181   : > { %1767 = vmatpush1.bf16.msra.mxu0 %v1766_v35  ;;  %v1736_v12 = vpack.c.bf16 %v1226_v10, %v1224_v9  ;;  %v1228_v15 = vld [vmem:[%s3477_s9 + $0x1e8] sm:$0xff]  ;;  %v1230_v16 = vld [vmem:[%s3477_s9 + $0x1f8] sm:$0xff]  ;;  %v1738_v17 = vpack.c.bf16 %v1225_v14, %v1223_v13  ;;  %v1227_v19 = vld [vmem:[%s3477_s9 + $0x1e0] sm:$0xff] }
 0x182   : > { %1711 = vmatpush1.bf16.msra.mxu1 %v1710_v20  ;;  %1769 = vmatprep.subr.bf16.mxu0 %v1768_v38  ;;  %v1740_v18 = vpack.c.bf16 %v1230_v16, %v1228_v15  ;;  %v1229_v20 = vld [vmem:[%s3477_s9 + $0x1f0] sm:$0xff]  ;;  %v1263_v27 = vld [vmem:[%s1154_s1] sm:$0x3] }
 0x183   : > { %1713 = vmatprep.subr.bf16.mxu1 %v1712_v24  ;;  %v1742_v21 = vpack.c.bf16 %v1229_v20, %v1227_v19  ;;  %v1265_v24 = vlaneseq }
 0x185   : > { %1771 = vmatpush1.bf16.msra.mxu0 %v1770_v46  ;;  %v1266_v25 = vshrl.u32 %v1265_v24, 7 }
 0x186   : > { %1715 = vmatpush1.bf16.msra.mxu1 %v1714_v32  ;;  %1773 = vmatprep.subr.bf16.mxu0 %v1772_v49 }
 0x187   : > { %1717 = vmatprep.subr.bf16.mxu1 %v1716_v36  ;;  %v1267_v26 = vsub.s32 0, %v1266_v25  ;;  %v1271_v28 = vsub.s32 1, %v1266_v25 }
 0x189   : > { %1775 = vmatpush1.bf16.msra.mxu0 %v1774_v55  ;;  %v1268_v29 = vrot.slane %v1263_v27, %v1267_v26 }
 0x18a   : > { %1719 = vmatpush1.bf16.msra.mxu1 %v1718_v44 }
 0x18b   : > { %1721 = vmatprep.subr.bf16.mxu1 %v1720_v47 }
 0x18c   : > { %1414 = vmatmul.mubr.f32.vlgmr.msra.gmra.mrb[0].mxu0 %v1166_v62 }
 0x18e   : > { %1723 = vmatpush1.bf16.msra.mxu1 %v1722_v54 }
 0x18f   : > { %1725 = vmatprep.subr.bf16.mxu1 %v1724_v56 }
 0x192   : > { %1727 = vmatpush1.bf16.msra.mxu1 %v1726_v61 }
 0x193   : > { %1729 = vmatprep.subr.bf16.mxu1 %v1728_v63 }
 0x196   : > { %1731 = vmatpush1.bf16.msra.mxu1 %v1730_v5 }
 0x197   : > { %1733 = vmatprep.subr.bf16.mxu1 %v1732_v6 }
 0x19a   : > { %1735 = vmatpush1.bf16.msra.mxu1 %v1734_v11 }
 0x19b   : > { %1737 = vmatprep.subr.bf16.mxu1 %v1736_v12 }
 0x19e   : > { %1739 = vmatpush1.bf16.msra.mxu1 %v1738_v17 }
 0x19f   : > { %1741 = vmatprep.subr.bf16.mxu1 %v1740_v18 }
 0x1a2   : > { %1743 = vmatpush1.bf16.msra.mxu1 %v1742_v21 }
 0x1a5   : > { %1343 = vmatmul.mubr.f32.vlgmr.msra.gmra.mrb[0].mxu1 %v3472_v0  ;;  %v1272_v0 = vrot.slane %v1263_v27, %v1271_v28 }
 0x25f   : > { %v1415_v22 = vpop.f32.mrb[0].mxu0 }
 0x260   : > { %v1417_v23 = vpop.f32.mrb[1].mxu0 }
 0x278   : > { %v1344_v30 = vpop.f32.mrb[0].mxu1 }
 0x279   : > { %v1345_v31 = vadd.f32 %v1344_v30, %v1268_v29  ;;  %v1346_v32 = vpop.f32.mrb[1].mxu1 }
 0x27a   : > { %v1347_v33 = vadd.f32 %v1346_v32, %v1272_v0 }
 0x27b   : > { %v1416_v34 = vadd.f32 %v1415_v22, %v1345_v31 }
 0x27c   : > { %v1418_v35 = vadd.f32 %v1417_v23, %v1347_v33 }
 0x27d   : > { %1968 = vtanh.f32 %v1416_v34 }
 0x27e   : > { %1970 = vtanh.f32 %v1418_v35 }
 0x285   : > { %1434 = sbr.rel (!%p2243_p5) target bundleno = 679 (0x2a7), region = 102 }
 0x287   : > { %v1969_v36 = vpop.eup %1968 }
 0x288   : > { %v1971_v37 = vpop.eup %1970 }
 0x289   : > { %v1424_v38 = vcombine.low %v1969_v36, %v1971_v37 }
 0x28b   : > { %1426 = vst [vmem:[%s1136_s26] sm:$0x77] %v1424_v38 }
 0x28c   : > { %s3698_s11 = smov (!%p1437_p11, %s1436_s11), 2 }
 0x28d   : > { %s3592_s23 = sshll.u32 %s3698_s11, 6 }
 0x28e   : > { %s1441_s20 = ssub.s32 128, %s3592_s23 }
 0x28f   : > { %1442 = vsyncadd %s1428_s21, %s1441_s20  ;;  %p1668_p12 = scmp.ne.s32.totalorder %s3592_s23, 0  ;;  %s1679_s10 = sshll.u32 %s2106_s15, 7 }
 0x290   : > { %s3602_s27 = scalar_lea.hbm %s3652_s3, %s1679_s10  ;;  %s1450_s6 = sshll.u32 %s1136_s26, 4  ;;  %s1451_s6 = int_to_ptr.vmem [resolvable:$true] %s1450_s6 }
 0x291   : > { %s1972_s9 = scalar_lea.vmem %s1451_s6, %s3592_s23  ;;  %s2183_s5 = smov [#allocation3]  }
 0x292   : > { %p1973_p5 = scmp.ne.s32.totalorder %s1451_s6, %s1972_s9  ;;  %s1976_s29 = sshll.u32 %s2183_s5, 4  ;;  %s1977_s29 = int_to_ptr.vmem [resolvable:$false] %s1976_s29 }
 0x293   : > { %s1978_s4 = scalar_lea.vmem %s1977_s29, 256  ;;  %p1979_p1 = scmp.lt.s32.totalorder %s1451_s6, %s1977_s29 }
 0x294   : > { %p1974_p13 = pnand %p1973_p5, %p1668_p12  ;;  %p1980_p2 = scmp.lt.s32.totalorder %s1978_s4, %s1972_s9 }
 0x296   : > { %p1975_p0 = pneg %p1974_p13  ;;  %p1981_p3 = por %p1980_p2, %p1979_p1 }
 0x298   : > { %p1982_p4 = pnand %p1981_p3, %p1975_p0 }
 0x29a   : > { %1985 = shalt.err (!%p1982_p4)
}
 0x29b   : > { %s1986_s15 = scalar_lea.hbm %s3602_s27, %s3592_s23  ;;  %s1990_s19 = scalar_lea.hbm %s3652_s3, 192 }
 0x29c   : > { %p1987_p6 = scmp.ne.s32.totalorder %s3602_s27, %s1986_s15  ;;  %p1991_p11 = scmp.lt.u32.totalorder %s3602_s27, %s3652_s3 }
 0x29d   : > { %p1992_p5 = scmp.lt.u32.totalorder %s1990_s19, %s1986_s15  ;;  %p1994_p0 = scmp.lt.u32.totalorder %s1986_s15, %s3602_s27 }
 0x29e   : > { %p1988_p7 = pnand %p1987_p6, %p1668_p12 }
 0x29f   : > { %p1993_p13 = por %p1992_p5, %p1991_p11 }
 0x2a0   : > { %p1989_p8 = pneg %p1988_p7 }
 0x2a1   : > { %p1995_p1 = por %p1994_p0, %p1993_p13 }
 0x2a3   : > { %p1996_p2 = pnand %p1995_p1, %p1989_p8 }
 0x2a5   : > { %1999 = shalt.err (!%p1996_p2)
}
 0x2a6   : > { %1453 = dma.vmem_to_hbm [thread:$0]  (%p1668_p12), %s1451_s6, %s3592_s23, %s3602_s27, %s1428_s21  }
 0x2a7 PF: > { %s1462_s26 = sand.u32 1, %s2094_s12   ;;  %p1784_p3 = pnand %p1636_p10, %p2254_p9 }
 0x2a8   : > { %s1463_s11 = scalar_lea.sflag [#allocation4], %s1462_s26 }
 0x2a9   : > { %2089 = dma.done.wait (!%p1784_p3), %s1463_s11, 128  }
 0x2aa   : > { %2091 = vsyncadd (!%p1784_p3), %s1463_s11, 4294967168  ;;  %s16_s17 = sadd.s32 1, %s2114_s17   ;;  %s3679_s8 = sld [smem:[#allocation6_spill]] }
 0x2ab   : > { %p13_p4 = scmp.ge.s32.totalorder %s16_s17, 4   ;;  %s3680_s12 = smov %s2098_s13 }
 0x2ac   : > { %s3681_s13 = smov %s2102_s14  ;;  %s3682_s14 = smov %s2252_s24 }
 0x2ad   : > { %s3683_s15 = smov %s2110_s16  ;;  %15 = sbr.rel (!%p13_p4) target bundleno = 6 (0x6), region = 206 }
 0x2b0   : > { %s3684_s16 = smov %s3679_s8 }
 0x2b4   :  { %1468 = vsyncpa [#allocation4], 1 }
 0x2b5   :  { %1470 = vsyncpa [#allocation4 + $0x1], 1 }

</bundles_post_ra>
